<compile_context>
chip_gen: v7x
topology: tpu7x:2x2x1
jax: 0.10.0
libtpu: 0.0.40
codegen_flags: <defaults>
</compile_context>

<pallas_src>
import functools

import jax
import jax.numpy as jnp
import numpy as np
from jax.experimental import pallas as pl
from jax.experimental.pallas import tpu as pltpu

FOCAL_ALPHA = 0.25
FOCAL_GAMMA = 2.0          # realized below as an explicit square (gamma == 2)
CONFIDENCE_WEIGHT = 0.1
PATTERN_WEIGHT = 0.01


def _interlayer_loss_kernel(logits_ref, pw_ref, side_ref, out_ref, *, n_valid):
    """Writes per-tile partial sums [focal, conf_se, entropy, count], lane-bcast."""
    rt, e = logits_ref.shape

    # Row validity: the trailing tile may extend past the end of the arrays
    # (Pallas delivers an unspecified pad region there), so mask by global row.
    row = pl.program_id(0) * rt + jax.lax.broadcasted_iota(jnp.int32, (rt, 1), 0)
    valid = row < n_valid                                      # (rt, 1) bool

    side = side_ref[...]                                       # (rt, 4) f32
    conf = side[:, 0:1]
    tgt = side[:, 1:2].astype(jnp.int32)                       # exact for ids < 2^24
    mbool = jnp.logical_and(valid, side[:, 2:3] > 0.5)         # NaN-safe combined mask
    mf = mbool.astype(jnp.float32)                             # (rt, 1)

    # Clamp masked / out-of-range rows so garbage never reaches exp/log.
    logits = jnp.where(mbool, logits_ref[...].astype(jnp.float32), 0.0)   # (rt, E)
    pw = jnp.where(mbool, pw_ref[...].astype(jnp.float32), 1.0)           # (rt, P)
    conf = jnp.where(mbool, conf, 0.0)

    col = jax.lax.broadcasted_iota(jnp.int32, (rt, e), 1)
    onehot = col == tgt                                        # (rt, E) bool

    # Stable log-softmax pieces, single exp pass (reused for tprob).
    row_max = jnp.max(logits, axis=-1, keepdims=True)          # (rt, 1)
    emat = jnp.exp(logits - row_max)                           # (rt, E)
    sumexp = jnp.sum(emat, axis=-1, keepdims=True)
    tgt_logit = jnp.sum(jnp.where(onehot, logits, 0.0), axis=-1, keepdims=True)
    tgt_exp = jnp.sum(jnp.where(onehot, emat, 0.0), axis=-1, keepdims=True)

    ce = row_max + jnp.log(sumexp) - tgt_logit                 # (rt, 1)
    tprob = tgt_exp / sumexp                                   # no second exp
    one_m = 1.0 - tprob
    focal = FOCAL_ALPHA * one_m * one_m * ce                   # explicit square

    # First-occurrence argmax along experts (matches torch.argmax).
    argmax_idx = jnp.min(jnp.where(logits == row_max, col, e),
                         axis=-1, keepdims=True)
    correct = (argmax_idx == tgt).astype(jnp.float32)
    diff = conf - correct
    conf_se = diff * diff

    entropy = -jnp.sum(pw * jnp.log(pw + 1e-8), axis=-1, keepdims=True)

    def bcast(v):                                              # tile-sum -> (1, 128)
        return jnp.full((1, 128), jnp.sum(v), jnp.float32)

    out_ref[...] = jnp.concatenate(
        [bcast(mf * focal), bcast(mf * conf_se), bcast(mf * entropy), bcast(mf)],
        axis=0)[None]


@functools.partial(jax.jit, static_argnames=("row_tile",))
def interlayer_loss(expert_logits, confidence, pattern_weights, targets,
                    mask=None, *, row_tile=1024):
    """JAX/Pallas equivalent of InterlayerLoss.forward.

    expert_logits:   [B, S, E]   (f32 or bf16, streamed in native dtype)
    confidence:      [B, S, 1]
    pattern_weights: [B, S, P]   (f32 or bf16)
    targets:         [B, S]      integer expert ids
    mask:            [B, S]      bool / {0,1}, or None
    """
    assert row_tile % 128 == 0
    b, s, e = expert_logits.shape
    p = pattern_weights.shape[-1]
    n = b * s

    logits2 = expert_logits.reshape(n, e)          # no dtype cast -> no HBM copy
    pw2 = pattern_weights.reshape(n, p)

    conf2 = confidence.reshape(n, 1).astype(jnp.float32)
    tgt2 = targets.reshape(n, 1).astype(jnp.float32)          # exact for ids < 2^24
    if mask is None:
        mask2 = jnp.ones((n, 1), jnp.float32)
    else:
        mask2 = mask.reshape(n, 1).astype(jnp.float32)
    side = jnp.concatenate(
        [conf2, tgt2, mask2, jnp.zeros((n, 1), jnp.float32)], axis=1)  # (n, 4)

    if n >= 128:
        rt = min(row_tile, (n // 128) * 128)   # block never exceeds the array
        rows = n                               # trailing partial tile masked in-kernel
    else:
        # Tiny-input fallback: pad up to a single 128-row tile (negligible copy).
        rt = 128
        rows = 128
        pad = rows - n
        logits2 = jnp.pad(logits2, ((0, pad), (0, 0)))
        pw2 = jnp.pad(pw2, ((0, pad), (0, 0)))
        side = jnp.pad(side, ((0, pad), (0, 0)))

    num_tiles = pl.cdiv(rows, rt)

    cost = pl.CostEstimate(
        flops=n * (10 * e + 6 * p + 40),
        transcendentals=n * (e + p + 2),
        bytes_accessed=(n * (e * expert_logits.dtype.itemsize
                             + p * pattern_weights.dtype.itemsize + 16)
                        + num_tiles * 4 * 128 * 4),
    )

    partials = pl.pallas_call(
        functools.partial(_interlayer_loss_kernel, n_valid=n),
        out_shape=jax.ShapeDtypeStruct((num_tiles, 4, 128), jnp.float32),
        grid_spec=pltpu.PrefetchScalarGridSpec(
            num_scalar_prefetch=0,
            grid=(num_tiles,),
            in_specs=[
                pl.BlockSpec((rt, e), lambda i: (i, 0)),
                pl.BlockSpec((rt, p), lambda i: (i, 0)),
                pl.BlockSpec((rt, 4), lambda i: (i, 0)),
            ],
            out_specs=pl.BlockSpec((1, 4, 128), lambda i: (i, 0, 0)),
        ),
        compiler_params=pltpu.CompilerParams(
            dimension_semantics=("parallel",)),
        cost_estimate=cost,
    )(logits2, pw2, side)

    sums = jnp.sum(partials[:, :, 0], axis=0)      # (4,) f32, reduced across tiles
    focal_sum, conf_sum, ent_sum, count = sums[0], sums[1], sums[2], sums[3]
    # Note: count == 0 (everything masked) yields NaN, same as torch's empty mean.
    focal_loss = focal_sum / count
    confidence_loss = conf_sum / count
    pattern_loss = -(ent_sum / count)
    total_loss = (focal_loss + CONFIDENCE_WEIGHT * confidence_loss
                  + PATTERN_WEIGHT * pattern_loss)
    return {
        "total_loss": total_loss,
        "focal_loss": focal_loss,
        "confidence_loss": confidence_loss,
        "pattern_loss": pattern_loss,
    }


def _reference_loss(expert_logits, confidence, pattern_weights, targets, mask):
    """Pure-numpy replication of the PyTorch forward (mask-select then mean)."""
    el = expert_logits.reshape(-1, expert_logits.shape[-1]).astype(np.float32)
    cf = confidence.reshape(-1).astype(np.float32)
    pw = pattern_weights.reshape(-1, pattern_weights.shape[-1]).astype(np.float32)
    tg = targets.reshape(-1).astype(np.int64)
    mk = mask.reshape(-1).astype(bool)
    el, cf, pw, tg = el[mk], cf[mk], pw[mk], tg[mk]

    row_max = el.max(-1, keepdims=True)
    lse = row_max[:, 0] + np.log(np.exp(el - row_max).sum(-1))
    tgt_logit = el[np.arange(el.shape[0]), tg]
    ce = lse - tgt_logit
    tprob = np.exp(tgt_logit - lse)
    focal = (FOCAL_ALPHA * (1.0 - tprob) ** FOCAL_GAMMA * ce).mean()
    correct = (el.argmax(-1) == tg).astype(np.float32)
    conf_loss = ((cf - correct) ** 2).mean()
    ent = -(pw * np.log(pw + 1e-8)).sum(-1)
    pat_loss = -ent.mean()
    total = focal + CONFIDENCE_WEIGHT * conf_loss + PATTERN_WEIGHT * pat_loss
    return dict(total_loss=total, focal_loss=focal,
                confidence_loss=conf_loss, pattern_loss=pat_loss)


if __name__ == "__main__":
    key = jax.random.PRNGKey(0)

    def run_case(B, S, E, P, logits_dtype, use_mask, k):
        k1, k2, k3, k4, k5 = jax.random.split(k, 5)
        expert_logits = jax.random.normal(
            k1, (B, S, E), jnp.float32).astype(logits_dtype)
        confidence = jax.nn.sigmoid(jax.random.normal(k2, (B, S, 1), jnp.float32))
        pattern_weights = jax.nn.softmax(
            jax.random.normal(k3, (B, S, P), jnp.float32), axis=-1
        ).astype(logits_dtype)
        targets = jax.random.randint(k4, (B, S), 0, E, jnp.int32)
        if use_mask:
            mask = jax.random.bernoulli(k5, 0.85, (B, S))
            mask = mask.at[0, 0].set(True)      # ensure >= 1 valid position
        else:
            mask = None

        out = interlayer_loss(expert_logits, confidence, pattern_weights,
                              targets, mask)
        out = jax.block_until_ready(out)

        ref = _reference_loss(
            np.asarray(expert_logits.astype(jnp.float32)),
            np.asarray(confidence, np.float32),
            np.asarray(pattern_weights.astype(jnp.float32)),
            np.asarray(targets),
            np.ones((B, S), bool) if mask is None else np.asarray(mask),
        )
        for name in ("total_loss", "focal_loss", "confidence_loss",
                     "pattern_loss"):
            np.testing.assert_allclose(np.asarray(out[name]), ref[name],
                                       rtol=1e-4, atol=1e-5)

    keys = jax.random.split(key, 3)
    # Module-default num_experts=128; tiny N -> single padded 128-row tile path.
    run_case(B=2, S=8, E=128, P=16, logits_dtype=jnp.float32, use_mask=True,
             k=keys[0])
    # N=150 -> 2 tiles with a partial trailing tile (in-kernel tail masking).
    run_case(B=3, S=50, E=128, P=16, logits_dtype=jnp.float32, use_mask=True,
             k=keys[1])
    # bf16 inputs streamed in native dtype, mask=None path.
    run_case(B=2, S=96, E=128, P=16, logits_dtype=jnp.bfloat16, use_mask=False,
             k=keys[2])

    print("KERNEL_OK")
</pallas_src>

<mosaic_0001>
module attributes {stable_mosaic.version = 11 : i64} {
  func.func @_interlayer_loss_kernel(%arg0: i32, %arg1: memref<128x128xf32, #tpu.memory_space<vmem>>, %arg2: memref<128x16xf32, #tpu.memory_space<vmem>>, %arg3: memref<128x4xf32, #tpu.memory_space<vmem>>, %arg4: memref<1x4x128xf32, #tpu.memory_space<vmem>>) attributes {dimension_semantics = [#tpu.dimension_semantics<parallel>], iteration_bounds = array<i64: 1>, scalar_prefetch = 0 : i64, scratch_operands = 0 : i64, tpu.core_type = #tpu.core_type<tc>, window_params = [{transform_indices = @transform_0, window_bounds = array<i64: 128, 128>}, {transform_indices = @transform_1, window_bounds = array<i64: 128, 16>}, {transform_indices = @transform_2, window_bounds = array<i64: 128, 4>}, {transform_indices = @transform_3, window_bounds = array<i64: 1, 4, 128>}]} {
    %c128_i32 = arith.constant 128 : i32
    %0 = arith.muli %arg0, %c128_i32 : i32
    %1 = tpu.iota {dimensions = array<i32: 0>} : vector<128x1xi32>
    %2 = vector.broadcast %0 : i32 to vector<128x1xi32>
    %3 = arith.addi %2, %1 : vector<128x1xi32>
    %c16_i32 = arith.constant 16 : i32
    %4 = vector.broadcast %c16_i32 : i32 to vector<128x1xi32>
    %5 = arith.cmpi slt, %3, %4 : vector<128x1xi32>
    %c0 = arith.constant 0 : index
    %c0_0 = arith.constant 0 : index
    %6 = vector.load %arg3[%c0, %c0_0] : memref<128x4xf32, #tpu.memory_space<vmem>>, vector<128x4xf32>
    %7 = vector.extract_strided_slice %6 {offsets = [0, 0], sizes = [128, 1], strides = [1, 1]} : vector<128x4xf32> to vector<128x1xf32>
    %8 = vector.extract_strided_slice %6 {offsets = [0, 1], sizes = [128, 1], strides = [1, 1]} : vector<128x4xf32> to vector<128x1xf32>
    %9 = arith.fptosi %8 : vector<128x1xf32> to vector<128x1xi32>
    %10 = vector.extract_strided_slice %6 {offsets = [0, 2], sizes = [128, 1], strides = [1, 1]} : vector<128x4xf32> to vector<128x1xf32>
    %cst = arith.constant 5.000000e-01 : f32
    %11 = vector.broadcast %cst : f32 to vector<128x1xf32>
    %12 = arith.cmpf ogt, %10, %11 : vector<128x1xf32>
    %13 = arith.andi %5, %12 : vector<128x1xi1>
    %14 = arith.extui %13 : vector<128x1xi1> to vector<128x1xi32>
    %15 = arith.sitofp %14 : vector<128x1xi32> to vector<128x1xf32>
    %c0_1 = arith.constant 0 : index
    %c0_2 = arith.constant 0 : index
    %16 = vector.load %arg1[%c0_1, %c0_2] : memref<128x128xf32, #tpu.memory_space<vmem>>, vector<128x128xf32>
    %cst_3 = arith.constant 0.000000e+00 : f32
    %17 = vector.shape_cast %13 : vector<128x1xi1> to vector<128x1xi1>
    %18 = vector.broadcast %17 : vector<128x1xi1> to vector<128x128xi1>
    %19 = vector.broadcast %cst_3 : f32 to vector<128x128xf32>
    %20 = arith.select %18, %16, %19 : vector<128x128xi1>, vector<128x128xf32>
    %c0_4 = arith.constant 0 : index
    %c0_5 = arith.constant 0 : index
    %21 = vector.load %arg2[%c0_4, %c0_5] : memref<128x16xf32, #tpu.memory_space<vmem>>, vector<128x16xf32>
    %cst_6 = arith.constant 1.000000e+00 : f32
    %22 = vector.shape_cast %13 : vector<128x1xi1> to vector<128x1xi1>
    %23 = vector.broadcast %22 : vector<128x1xi1> to vector<128x16xi1>
    %24 = vector.broadcast %cst_6 : f32 to vector<128x16xf32>
    %25 = arith.select %23, %21, %24 : vector<128x16xi1>, vector<128x16xf32>
    %cst_7 = arith.constant 0.000000e+00 : f32
    %26 = vector.broadcast %cst_7 : f32 to vector<128x1xf32>
    %27 = arith.select %13, %7, %26 : vector<128x1xi1>, vector<128x1xf32>
    %28 = tpu.iota {dimensions = array<i32: 1>} : vector<128x128xi32>
    %29 = vector.broadcast %9 : vector<128x1xi32> to vector<128x128xi32>
    %30 = arith.cmpi eq, %28, %29 : vector<128x128xi32>
    %cst_8 = arith.constant dense<0xFF800000> : vector<128xf32>
    %31 = vector.multi_reduction <maximumf>, %20, %cst_8 [1] : vector<128x128xf32> to vector<128xf32>
    %32 = vector.shape_cast %31 : vector<128xf32> to vector<128x1xf32>
    %33 = vector.broadcast %32 : vector<128x1xf32> to vector<128x128xf32>
    %34 = arith.subf %20, %33 : vector<128x128xf32>
    %35 = math.exp %34 : vector<128x128xf32>
    %cst_9 = arith.constant dense<0.000000e+00> : vector<128xf32>
    %36 = vector.multi_reduction <add>, %35, %cst_9 [1] : vector<128x128xf32> to vector<128xf32>
    %37 = vector.shape_cast %36 : vector<128xf32> to vector<128x1xf32>
    %cst_10 = arith.constant 0.000000e+00 : f32
    %38 = vector.broadcast %cst_10 : f32 to vector<128x128xf32>
    %39 = arith.select %30, %20, %38 : vector<128x128xi1>, vector<128x128xf32>
    %cst_11 = arith.constant dense<0.000000e+00> : vector<128xf32>
    %40 = vector.multi_reduction <add>, %39, %cst_11 [1] : vector<128x128xf32> to vector<128xf32>
    %41 = vector.shape_cast %40 : vector<128xf32> to vector<128x1xf32>
    %cst_12 = arith.constant 0.000000e+00 : f32
    %42 = vector.broadcast %cst_12 : f32 to vector<128x128xf32>
    %43 = arith.select %30, %35, %42 : vector<128x128xi1>, vector<128x128xf32>
    %cst_13 = arith.constant dense<0.000000e+00> : vector<128xf32>
    %44 = vector.multi_reduction <add>, %43, %cst_13 [1] : vector<128x128xf32> to vector<128xf32>
    %45 = vector.shape_cast %44 : vector<128xf32> to vector<128x1xf32>
    %46 = math.log %37 : vector<128x1xf32>
    %47 = arith.addf %32, %46 : vector<128x1xf32>
    %48 = arith.subf %47, %41 : vector<128x1xf32>
    %49 = arith.divf %45, %37 : vector<128x1xf32>
    %cst_14 = arith.constant 1.000000e+00 : f32
    %50 = vector.broadcast %cst_14 : f32 to vector<128x1xf32>
    %51 = arith.subf %50, %49 : vector<128x1xf32>
    %cst_15 = arith.constant 2.500000e-01 : f32
    %52 = vector.broadcast %cst_15 : f32 to vector<128x1xf32>
    %53 = arith.mulf %52, %51 : vector<128x1xf32>
    %54 = arith.mulf %53, %51 : vector<128x1xf32>
    %55 = arith.mulf %54, %48 : vector<128x1xf32>
    %56 = vector.broadcast %32 : vector<128x1xf32> to vector<128x128xf32>
    %57 = arith.cmpf oeq, %20, %56 : vector<128x128xf32>
    %c128_i32_16 = arith.constant 128 : i32
    %58 = vector.broadcast %c128_i32_16 : i32 to vector<128x128xi32>
    %59 = arith.select %57, %28, %58 : vector<128x128xi1>, vector<128x128xi32>
    %cst_17 = arith.constant dense<2147483647> : vector<128xi32>
    %60 = vector.multi_reduction <minsi>, %59, %cst_17 [1] : vector<128x128xi32> to vector<128xi32>
    %61 = vector.shape_cast %60 : vector<128xi32> to vector<128x1xi32>
    %62 = arith.cmpi eq, %61, %9 : vector<128x1xi32>
    %63 = arith.extui %62 : vector<128x1xi1> to vector<128x1xi32>
    %64 = arith.sitofp %63 : vector<128x1xi32> to vector<128x1xf32>
    %65 = arith.subf %27, %64 : vector<128x1xf32>
    %66 = arith.mulf %65, %65 : vector<128x1xf32>
    %cst_18 = arith.constant 9.99999993E-9 : f32
    %67 = vector.broadcast %cst_18 : f32 to vector<128x16xf32>
    %68 = arith.addf %25, %67 : vector<128x16xf32>
    %69 = math.log %68 : vector<128x16xf32>
    %70 = arith.mulf %25, %69 : vector<128x16xf32>
    %cst_19 = arith.constant dense<0.000000e+00> : vector<128xf32>
    %71 = vector.multi_reduction <add>, %70, %cst_19 [1] : vector<128x16xf32> to vector<128xf32>
    %72 = vector.shape_cast %71 : vector<128xf32> to vector<128x1xf32>
    %cst_20 = arith.constant 0.000000e+00 : f32
    %73 = vector.broadcast %cst_20 : f32 to vector<128x1xf32>
    %74 = arith.subf %73, %72 : vector<128x1xf32>
    %75 = arith.mulf %15, %55 : vector<128x1xf32>
    %76 = vector.shape_cast %75 : vector<128x1xf32> to vector<1x128x1xf32>
    %cst_21 = arith.constant dense<0.000000e+00> : vector<1xf32>
    %77 = vector.multi_reduction <add>, %76, %cst_21 [1, 2] : vector<1x128x1xf32> to vector<1xf32>
    %78 = vector.shape_cast %77 : vector<1xf32> to vector<1x1x1xf32>
    %79 = vector.extract %78[0, 0, 0] : f32 from vector<1x1x1xf32>
    %80 = vector.broadcast %79 : f32 to vector<1x128xf32>
    %81 = arith.mulf %15, %66 : vector<128x1xf32>
    %82 = vector.shape_cast %81 : vector<128x1xf32> to vector<1x128x1xf32>
    %cst_22 = arith.constant dense<0.000000e+00> : vector<1xf32>
    %83 = vector.multi_reduction <add>, %82, %cst_22 [1, 2] : vector<1x128x1xf32> to vector<1xf32>
    %84 = vector.shape_cast %83 : vector<1xf32> to vector<1x1x1xf32>
    %85 = vector.extract %84[0, 0, 0] : f32 from vector<1x1x1xf32>
    %86 = vector.broadcast %85 : f32 to vector<1x128xf32>
    %87 = arith.mulf %15, %74 : vector<128x1xf32>
    %88 = vector.shape_cast %87 : vector<128x1xf32> to vector<1x128x1xf32>
    %cst_23 = arith.constant dense<0.000000e+00> : vector<1xf32>
    %89 = vector.multi_reduction <add>, %88, %cst_23 [1, 2] : vector<1x128x1xf32> to vector<1xf32>
    %90 = vector.shape_cast %89 : vector<1xf32> to vector<1x1x1xf32>
    %91 = vector.extract %90[0, 0, 0] : f32 from vector<1x1x1xf32>
    %92 = vector.broadcast %91 : f32 to vector<1x128xf32>
    %93 = vector.shape_cast %15 : vector<128x1xf32> to vector<1x128x1xf32>
    %cst_24 = arith.constant dense<0.000000e+00> : vector<1xf32>
    %94 = vector.multi_reduction <add>, %93, %cst_24 [1, 2] : vector<1x128x1xf32> to vector<1xf32>
    %95 = vector.shape_cast %94 : vector<1xf32> to vector<1x1x1xf32>
    %96 = vector.extract %95[0, 0, 0] : f32 from vector<1x1x1xf32>
    %97 = vector.broadcast %96 : f32 to vector<1x128xf32>
    %98 = tpu.concatenate %80, %86, %92, %97 in 0 : vector<1x128xf32>, vector<1x128xf32>, vector<1x128xf32>, vector<1x128xf32> -> vector<4x128xf32>
    %99 = vector.shape_cast %98 : vector<4x128xf32> to vector<1x4x128xf32>
    %c0_25 = arith.constant 0 : index
    %c0_26 = arith.constant 0 : index
    %c0_27 = arith.constant 0 : index
    %100 = vector.load %arg4[%c0_25, %c0_26, %c0_27] : memref<1x4x128xf32, #tpu.memory_space<vmem>>, vector<1x4x128xf32>
    tpu.vector_store %arg4[%c0_25, %c0_26, %c0_27], %99 {strides = array<i32>} : memref<1x4x128xf32, #tpu.memory_space<vmem>>, vector<1x4x128xf32>,
    return
  }
  func.func @transform_0(%arg0: i32) -> (i32, i32) {
    %c0_i32 = arith.constant 0 : i32
    %c0_i32_0 = arith.constant 0 : i32
    return %arg0, %c0_i32 : i32, i32
  }
  func.func @transform_1(%arg0: i32) -> (i32, i32) {
    %c0_i32 = arith.constant 0 : i32
    %c0_i32_0 = arith.constant 0 : i32
    return %arg0, %c0_i32 : i32, i32
  }
  func.func @transform_2(%arg0: i32) -> (i32, i32) {
    %c0_i32 = arith.constant 0 : i32
    %c0_i32_0 = arith.constant 0 : i32
    return %arg0, %c0_i32 : i32, i32
  }
  func.func @transform_3(%arg0: i32) -> (i32, i32, i32) {
    %c0_i32 = arith.constant 0 : i32
    %c0_i32_0 = arith.constant 0 : i32
    %c0_i32_1 = arith.constant 0 : i32
    return %arg0, %c0_i32, %c0_i32_0 : i32, i32, i32
  }
}

</mosaic_0001>

<bundles_post_ra>
// kernel: interlayer_loss.1
= control target key start
LH: loop header
LB: loop body
LE: loop exit
PB: predicated region body
PF: predicated region fallthrough
CT: control target
= control target key end

     0   :  { %v2119_v0 = vmov 2   ;;  %v2120_v3 = vmov 0   ;;  %s2121_s18 = smov 2   ;;  %v2122_v10 = vmov 1   ;;  %s2125_s24 = smov 1   ;;  %s3593_s2 = inlined_call_operand.vmem [shape: f32[128,4], index: 2, kind: input, shape index: {}]   ;;  %s3594_s0 = inlined_call_operand.vmem [shape: f32[128,128], index: 0, kind: input, shape index: {}]   ;;  %s3595_s1 = inlined_call_operand.vmem [shape: f32[128,16], index: 1, kind: input, shape index: {}]   ;;  %s3596_s3 = inlined_call_operand.vmem [shape: f32[1,4,128], index: 3, kind: output, shape index: {}]  }
   0x1   :  { %1877 = vset.pattern.permute.xlu1 %v2119_v0  ;;  %1888 = vset.pattern.permute.xlu0 %v2119_v0  ;;  %v2149_v1 = vld [vmem:[%s3593_s2] sm:$0xff]  ;;  %v2154_v2 = vld [vmem:[%s3593_s2 + $0x8] sm:$0xff]  ;;  %v67_v7 = vld [vmem:[%s3593_s2 + $0x10] sm:$0xff] }
   0x2   :  { %3664 = vst [vmem:[#allocation2_spill] sm:$0xff] %v2149_v1  ;;  %3665 = vst [vmem:[#allocation3_spill] sm:$0xff] %v2154_v2  ;;  %vm3614_vm0 = vcmp.gt.f32.partialorder %v2149_v1, 0.5  ;;  %vm3613_vm1 = vcmp.gt.f32.partialorder %v2154_v2, 0.5  ;;  %1879 = vperm.xlu1 %1877, %v2120_v3   ;;  %v1830_v6 = vtrunc.f32 %v2149_v1  ;;  %v1834_v9 = vtrunc.f32 %v67_v7  ;;  %v68_v12 = vld [vmem:[%s3593_s2 + $0x18] sm:$0xff]  ;;  %v69_v13 = vld [vmem:[%s3593_s2 + $0x20] sm:$0xff] }
   0x3   :  { %v129_v4 = vsel %vm3614_vm0, 1, %v2120_v3  ;;  %v130_v5 = vsel %vm3613_vm1, 1, %v2120_v3  ;;  %v1832_v11 = vtrunc.f32 %v2154_v2  ;;  %v1836_v15 = vtrunc.f32 %v68_v12  ;;  %v70_v18 = vld [vmem:[%s3593_s2 + $0x28] sm:$0xff]  ;;  %v71_v19 = vld [vmem:[%s3593_s2 + $0x30] sm:$0xff]  ;;  %v72_v24 = vld [vmem:[%s3593_s2 + $0x38] sm:$0xff] }
   0x4   :  { %178 = vperm.xlu0 %1888, %v129_v4   ;;  %v2167_v8 = vcvt.f32.s32 %v1830_v6  ;;  %v2177_v14 = vcvt.f32.s32 %v1834_v9  ;;  %v1838_v17 = vtrunc.f32 %v69_v13  ;;  %v1840_v21 = vtrunc.f32 %v70_v18  ;;  %v73_v25 = vld [vmem:[%s3593_s2 + $0x40] sm:$0xff]  ;;  %v74_v30 = vld [vmem:[%s3593_s2 + $0x48] sm:$0xff]  ;;  %v75_v31 = vld [vmem:[%s3593_s2 + $0x50] sm:$0xff] }
   0x5   :  { %v2180_v16 = vcvt.f32.s32 %v1832_v11  ;;  %v2189_v20 = vcvt.f32.s32 %v1836_v15  ;;  %v1842_v23 = vtrunc.f32 %v71_v19  ;;  %v1844_v27 = vtrunc.f32 %v72_v24  ;;  %v76_v36 = vld [vmem:[%s3593_s2 + $0x58] sm:$0xff]  ;;  %v77_v37 = vld [vmem:[%s3593_s2 + $0x60] sm:$0xff]  ;;  %v78_v42 = vld [vmem:[%s3593_s2 + $0x68] sm:$0xff] }
   0x6   :  { %1884 = vperm.xlu1 %1877, %v2120_v3   ;;  %3666 = vst [vmem:[#allocation4_spill] sm:$0xff] %v2167_v8  ;;  %3667 = vst [vmem:[#allocation5_spill] sm:$0xff] %v2177_v14  ;;  %v2192_v22 = vcvt.f32.s32 %v1838_v17  ;;  %v2201_v26 = vcvt.f32.s32 %v1840_v21  ;;  %v1846_v29 = vtrunc.f32 %v73_v25  ;;  %v1848_v33 = vtrunc.f32 %v74_v30  ;;  %v79_v43 = vld [vmem:[%s3593_s2 + $0x70] sm:$0xff]  ;;  %v80_v48 = vld [vmem:[%s3593_s2 + $0x78] sm:$0xff] }
   0x7   :  { %3668 = vst [vmem:[#allocation6_spill] sm:$0xff] %v2180_v16  ;;  %3669 = vst [vmem:[#allocation7_spill] sm:$0xff] %v2189_v20  ;;  %v2204_v28 = vcvt.f32.s32 %v1842_v23  ;;  %v2213_v32 = vcvt.f32.s32 %v1844_v27  ;;  %v1850_v35 = vtrunc.f32 %v75_v31  ;;  %v1852_v39 = vtrunc.f32 %v76_v36  ;;  %v163_v57 = vld [vmem:[%s3594_s0 + $0x10] sm:$0xff]  ;;  %v164_v4 = vld [vmem:[%s3594_s0 + $0x18] sm:$0xff] }
   0x8   :  { %181 = vperm.xlu0 %1888, %v130_v5   ;;  %3670 = vst [vmem:[#allocation8_spill] sm:$0xff] %v2192_v22  ;;  %3671 = vst [vmem:[#allocation9_spill] sm:$0xff] %v2201_v26  ;;  %v2216_v34 = vcvt.f32.s32 %v1846_v29  ;;  %v2225_v38 = vcvt.f32.s32 %v1848_v33  ;;  %v1854_v41 = vtrunc.f32 %v77_v37  ;;  %v1856_v45 = vtrunc.f32 %v78_v42  ;;  %v166_v12 = vld [vmem:[%s3594_s0 + $0x28] sm:$0xff]  ;;  %v167_v18 = vld [vmem:[%s3594_s0 + $0x30] sm:$0xff] }
   0x9   :  { %3672 = vst [vmem:[#allocation10_spill] sm:$0xff] %v2204_v28  ;;  %3673 = vst [vmem:[#allocation11_spill] sm:$0xff] %v2213_v32  ;;  %v2228_v40 = vcvt.f32.s32 %v1850_v35  ;;  %v2237_v44 = vcvt.f32.s32 %v1852_v39  ;;  %v1858_v47 = vtrunc.f32 %v79_v43  ;;  %v1860_v50 = vtrunc.f32 %v80_v48  ;;  %v168_v30 = vld [vmem:[%s3594_s0 + $0x38] sm:$0xff]  ;;  %v169_v35 = vld [vmem:[%s3594_s0 + $0x40] sm:$0xff] }
   0xa   :  { %1895 = vperm.xlu1 %1877, %v2120_v3   ;;  %3674 = vst [vmem:[#allocation12_spill] sm:$0xff] %v2216_v34  ;;  %3675 = vst [vmem:[#allocation13_spill] sm:$0xff] %v2225_v38  ;;  %v2240_v46 = vcvt.f32.s32 %v1854_v41  ;;  %v2246_v49 = vcvt.f32.s32 %v1856_v45  ;;  %v265_v42 = vld [vmem:[%s3595_s1 + $0x40] sm:$0xff]  ;;  %v266_v43 = vld [vmem:[%s3595_s1 + $0x48] sm:$0xff] }
   0xb   :  { %3676 = vst [vmem:[#allocation14_spill] sm:$0xff] %v2228_v40  ;;  %3677 = vst [vmem:[#allocation15_spill] sm:$0xff] %v2237_v44  ;;  %v2249_v51 = vcvt.f32.s32 %v1858_v47  ;;  %v2252_v52 = vcvt.f32.s32 %v1860_v50  ;;  %v170_v48 = vld [vmem:[%s3594_s0 + $0x48] sm:$0xff] }
   0xc   :  { %1890 = vperm.xlu0 %1888, %v2120_v3   ;;  %3678 = vst [vmem:[#allocation16_spill] sm:$0xff] %v2240_v46  ;;  %3679 = vst [vmem:[#allocation17_spill] sm:$0xff] %v2246_v49  ;;  %v258_v5 = vld [vmem:[%s3595_s1 + $0x8] sm:$0xff] }
   0xd   :  { %3680 = vst [vmem:[#allocation18_spill] sm:$0xff] %v2249_v51  ;;  %3681 = vst [vmem:[#allocation19_spill] sm:$0xff] %v2252_v52 }
   0xe   :  { %1905 = vperm.xlu1 %1877, %v2120_v3  }
  0x10   :  { %1900 = vperm.xlu0 %1888, %v2120_v3  }
  0x12   :  { %305 = vrot.lane.b32.xlu1 %v2149_v1, %s2121_s18 }
  0x13   :  { %1914 = vset.pattern.permute.xlu1 %v2122_v10 }
  0x14   :  { %1910 = vperm.xlu0 %1888, %v2120_v3   ;;  %v165_v3 = vld [vmem:[%s3594_s0 + $0x20] sm:$0xff] }
  0x16   :  { %372 = vperm.xlu1 %1914, %v2167_v8  }
  0x18   :  { %307 = vrot.lane.b32.xlu0 %v2154_v2, %s2121_s18 }
  0x19   :  { %1915 = vset.pattern.permute.xlu0 %v2122_v10 }
  0x1a   :  { %378 = vperm.xlu1 %1914, %v2177_v14  }
  0x1c   :  { %375 = vperm.xlu0 %1915, %v2180_v16  }
  0x1e   :  { %381 = vperm.xlu1 %1914, %v2189_v20  }
  0x20   :  { %384 = vperm.xlu0 %1915, %v2192_v22   ;;  %v264_v22 = vld [vmem:[%s3595_s1 + $0x38] sm:$0xff] }
  0x22   :  { %387 = vperm.xlu1 %1914, %v2201_v26  }
  0x24   :  { %390 = vperm.xlu0 %1915, %v2204_v28  }
  0x26   :  { %393 = vperm.xlu1 %1914, %v2213_v32  }
  0x28   :  { %396 = vperm.xlu0 %1915, %v2216_v34  }
  0x2a   :  { %399 = vperm.xlu1 %1914, %v2225_v38  }
  0x2c   :  { %402 = vperm.xlu0 %1915, %v2228_v40  }
  0x2e   :  { %405 = vperm.xlu1 %1914, %v2237_v44  }
  0x30   :  { %408 = vperm.xlu0 %1915, %v2240_v46  }
  0x32   :  { %411 = vperm.xlu1 %1914, %v2246_v49  }
  0x34   :  { %414 = vperm.xlu0 %1915, %v2249_v51  }
  0x36   :  { %417 = vperm.xlu1 %1914, %v2252_v52  }
  0x81   :  { %v1880_v53 = vpop.permute.xlu1 %1879 }
  0x82   :  { %v1882_v54 = vunpack.i.h.bf16 %v1880_v53  ;;  %v1881_v55 = vunpack.i.l.bf16 %v1880_v53 }
  0x83   :  { %v2256_v56 = vpop.permute.xlu0 %178 }
  0x84   :  { %vm2261_vm2 = vcmp.eq.s32.totalorder %v1881_v55, 1  ;;  %vm2269_vm3 = vcmp.eq.s32.totalorder %v1882_v54, 1  ;;  %v171_v54 = vld [vmem:[%s3594_s0 + $0x50] sm:$0xff] }
  0x85   :  { %v1885_v59 = vpop.permute.xlu1 %1884  ;;  %v2267_v60 = vsel %vm2261_vm2, %v163_v57, 0.0  ;;  %v2292_v9 = vsel %vm2269_vm3, %v164_v4, 0.0 }
  0x86   :  { %v1887_v62 = vunpack.i.h.bf16 %v1885_v59  ;;  %v1886_v63 = vunpack.i.l.bf16 %v1885_v59  ;;  %439 = vmax.xlane.f32.xlu0 %v2267_v60 }
  0x87   :  { %v2273_v0 = vpop.permute.xlu0 %181 }
  0x88   :  { %vm2282_vm4 = vcmp.eq.s32.totalorder %v1886_v63, 1  ;;  %vm2294_vm5 = vcmp.eq.s32.totalorder %v1887_v62, 1  ;;  %v175_v62 = vld [vmem:[%s3594_s0 + $0x70] sm:$0xff] }
  0x89   :  { %v1896_v6 = vpop.permute.xlu1 %1895  ;;  %v2288_v7 = vsel %vm2282_vm4, %v165_v3, 0.0  ;;  %v2312_v24 = vsel %vm2294_vm5, %v166_v12, 0.0 }
  0x8a   :  { %443 = vmax.xlane.f32.xlu1 %v2288_v7  ;;  %441 = vmax.xlane.f32.xlu0 %v2292_v9  ;;  %v1897_v13 = vunpack.i.l.bf16 %v1896_v6  ;;  %v1898_v19 = vunpack.i.h.bf16 %v1896_v6  ;;  %v268_v6 = vld [vmem:[%s3595_s1 + $0x58] sm:$0xff] }
  0x8b   :  { %v1891_v11 = vpop.permute.xlu0 %1890 }
  0x8c   :  { %v1893_v15 = vunpack.i.h.bf16 %v1891_v11  ;;  %v1892_v17 = vunpack.i.l.bf16 %v1891_v11  ;;  %vm2326_vm8 = vcmp.eq.s32.totalorder %v1897_v13, 1  ;;  %vm2334_vm9 = vcmp.eq.s32.totalorder %v1898_v19, 1  ;;  %v173_v19 = vld [vmem:[%s3594_s0 + $0x60] sm:$0xff] }
  0x8d   :  { %v1906_v23 = vpop.permute.xlu1 %1905  ;;  %v2353_v47 = vsel %vm2326_vm8, %v169_v35, 0.0  ;;  %v2368_v55 = vsel %vm2326_vm8, %v265_v42, 1.0  ;;  %v2372_v57 = vsel %vm2334_vm9, %v266_v43, 1.0  ;;  %v2382_v3 = vsel %vm2334_vm9, %v170_v48, 0.0  ;;  %v174_v35 = vld [vmem:[%s3594_s0 + $0x68] sm:$0xff]  ;;  %v267_v48 = vld [vmem:[%s3595_s1 + $0x50] sm:$0xff] }
  0x8e   :  { %vm2306_vm6 = vcmp.eq.s32.totalorder %v1892_v17, 1  ;;  %vm2314_vm7 = vcmp.eq.s32.totalorder %v1893_v15, 1  ;;  %445 = vmax.xlane.f32.xlu0 %v2312_v24  ;;  %v1907_v50 = vunpack.i.l.bf16 %v1906_v23  ;;  %v1908_v59 = vunpack.i.h.bf16 %v1906_v23  ;;  %v172_v15 = vld [vmem:[%s3594_s0 + $0x58] sm:$0xff] }
  0x8f   :  { %v1901_v27 = vpop.permute.xlu0 %1900  ;;  %v2321_v29 = vsel %vm2306_vm6, %v167_v18, 0.0  ;;  %v2342_v41 = vsel %vm2314_vm7, %v168_v30, 0.0  ;;  %v1211_v4 = vadd.f32 1e-08, %v2368_v55  ;;  %v1212_v23 = vadd.f32 1e-08, %v2372_v57 }
  0x90   :  { %v1902_v33 = vunpack.i.l.bf16 %v1901_v27  ;;  %447 = vmax.xlane.f32.xlu1 %v2321_v29  ;;  %v1903_v37 = vunpack.i.h.bf16 %v1901_v27  ;;  %vm2398_vm12 = vcmp.eq.s32.totalorder %v1907_v50, 1  ;;  %vm2411_vm13 = vcmp.eq.s32.totalorder %v1908_v59, 1  ;;  %v270_v50 = vld [vmem:[%s3595_s1 + $0x68] sm:$0xff]  ;;  %v176_v17 = vld [vmem:[%s3594_s0 + $0x78] sm:$0xff]  ;;  %v271_v30 = vld [vmem:[%s3595_s1 + $0x70] sm:$0xff] }
  0x91   :  { %v2338_v39 = vpop.permute.xlu1 %305  ;;  %1991 = vlog2.f32 %v1211_v4  ;;  %v369_v4 = vlaneseq  ;;  %vm226_vm8 = vcmp.eq.s32.totalorder %v2273_v0, 1  ;;  %v280_v20 = vsel %vm2314_vm7, %v264_v22, 1.0 }
  0x92   :  { %3698 = vst [vmem:[#allocation20_spill] sm:$0xff] %v2338_v39  ;;  %449 = vmax.xlane.f32.xlu0 %v2342_v41  ;;  %vm2358_vm10 = vcmp.eq.s32.totalorder %v1902_v33, 1  ;;  %vm2374_vm11 = vcmp.eq.s32.totalorder %v1903_v37, 1  ;;  %v269_v37 = vld [vmem:[%s3595_s1 + $0x60] sm:$0xff]  ;;  %1993 = vlog2.f32 %v1212_v23  ;;  %v2605_v32 = vsel %vm226_vm8, %v258_v5, 1.0 }
  0x93   :  { %v1911_v45 = vpop.permute.xlu0 %1910  ;;  %v2393_v13 = vsel %vm2358_vm10, %v171_v54, 0.0  ;;  %v2409_v27 = vsel %vm2374_vm11, %v268_v6, 1.0  ;;  %v2419_v33 = vsel %vm2374_vm11, %v172_v15, 0.0  ;;  %v272_v54 = vld [vmem:[%s3595_s1 + $0x78] sm:$0xff]  ;;  %v2458_v6 = vsel %vm2411_vm13, %v174_v35, 0.0  ;;  %v162_v35 = vld [vmem:[%s3594_s0 + $0x8] sm:$0xff] }
  0x94   :  { %451 = vmax.xlane.f32.xlu1 %v2353_v47  ;;  %v1913_v11 = vunpack.i.h.bf16 %v1911_v45  ;;  %v1912_v18 = vunpack.i.l.bf16 %v1911_v45  ;;  %v1214_v36 = vadd.f32 1e-08, %v2409_v27  ;;  %v2437_v45 = vsel %vm2398_vm12, %v173_v19, 0.0 }
  0x95   :  { %v2378_v63 = vpop.permute.xlu1 %372  ;;  %v2464_v15 = vsel %vm2358_vm10, %v267_v48, 1.0  ;;  %v2472_v19 = vsel %vm2411_vm13, %v270_v50, 1.0  ;;  %v2517_v8 = vsel %vm226_vm8, %v162_v35, 0.0  ;;  %vm225_vm10 = vcmp.eq.s32.totalorder %v2256_v56, 1 }
  0x96   :  { %453 = vmax.xlane.f32.xlu0 %v2382_v3  ;;  %vm2428_vm14 = vcmp.eq.s32.totalorder %v1913_v11, 1  ;;  %vm2448_vm15 = vcmp.eq.s32.totalorder %v1912_v18, 1  ;;  %1995 = vlog2.f32 %v1214_v36  ;;  %v2468_v18 = vsel %vm2398_vm12, %v269_v37, 1.0 }
  0x97   :  { %v2388_v12 = vpop.permute.xlu0 %307  ;;  %v2476_v23 = vsel %vm2428_vm14, %v272_v54, 1.0  ;;  %v2486_v53 = vsel %vm2448_vm15, %v175_v62, 0.0  ;;  %v2496_v37 = vand.u32 127, %v369_v4  ;;  %v1213_v48 = vadd.f32 1e-08, %v2464_v15  ;;  %v161_v4 = vld [vmem:[%s3594_s0] sm:$0xff] }
  0x98   :  { %3703 = vst [vmem:[#allocation21_spill] sm:$0xff] %v2388_v12  ;;  %455 = vmax.xlane.f32.xlu1 %v2393_v13  ;;  %v1215_v50 = vadd.f32 1e-08, %v2468_v18  ;;  %v1216_v54 = vadd.f32 1e-08, %v2472_v19  ;;  %v2505_v12 = vsel %vm2428_vm14, %v176_v17, 0.0 }
  0x99   :  { %v2415_v31 = vpop.permute.xlu1 %378  ;;  %1997 = vlog2.f32 %v1213_v48  ;;  %v1218_v39 = vadd.f32 1e-08, %v2476_v23  ;;  %v2510_v16 = vsel %vm2448_vm15, %v271_v30, 1.0  ;;  %vm3615_vm9 = vcmp.eq.s32.totalorder %v2496_v37, %v2378_v63 }
  0x9a   :  { %457 = vmax.xlane.f32.xlu0 %v2419_v33  ;;  %1999 = vlog2.f32 %v1215_v50  ;;  %v1217_v42 = vadd.f32 1e-08, %v2510_v16  ;;  %v2529_v35 = vsel %vm225_vm10, %v161_v4, 0.0  ;;  %vm421_vm12 = vcmp.eq.s32.totalorder %v2496_v37, %v2415_v31  ;;  %v261_v4 = vld [vmem:[%s3595_s1 + $0x20] sm:$0xff] }
  0x9b   :  { %v2432_v43 = vpop.permute.xlu0 %375  ;;  %v1992_v17 = vpop.eup %1991  ;;  %2001 = vlog2.f32 %v1216_v54  ;;  %v547_v54 = vsel %vm3615_vm9, %v2529_v35, 0.0  ;;  %vm1267_vm13 = vcmask 130048  }
  0x9c   :  { %459 = vmax.xlane.f32.xlu1 %v2437_v45  ;;  %v1994_v59 = vpop.eup %1993  ;;  %v1236_v48 = vmul.f32 0.6931472, %v1992_v17  ;;  %2003 = vlog2.f32 %v1218_v39  ;;  %vm3616_vm11 = vcmp.eq.s32.totalorder %v2496_v37, %v2432_v43 }
  0x9d   :  { %v2460_v11 = vpop.permute.xlu1 %381  ;;  %v1238_v50 = vmul.f32 0.6931472, %v1994_v59  ;;  %2005 = vlog2.f32 %v1217_v42 }
  0x9e   :  { %461 = vmax.xlane.f32.xlu0 %v2458_v6  ;;  %v1259_v17 = vmul.f32 %v1236_v48, %v2368_v55  ;;  %v257_v55 = vld [vmem:[%s3595_s1] sm:$0xff]  ;;  %v548_v48 = vsel %vm3616_vm11, %v2517_v8, 0.0  ;;  %vm422_vm14 = vcmp.eq.s32.totalorder %v2496_v37, %v2460_v11 }
  0x9f   :  { %v2481_v36 = vpop.permute.xlu0 %384  ;;  %v1260_v42 = vmul.f32 %v1238_v50, %v2372_v57  ;;  %v2570_v57 = vsel %vm2282_vm4, %v261_v4, 1.0 }
  0xa0   :  { %463 = vmax.xlane.f32.xlu1 %v2486_v53  ;;  %v1996_v52 = vpop.eup %1995  ;;  %v2548_v59 = vsel %vm1267_vm13, %v1259_v17, 0.0  ;;  %vm423_vm15 = vcmp.eq.s32.totalorder %v2496_v37, %v2481_v36  ;;  %v1207_v56 = vadd.f32 1e-08, %v2570_v57 }
  0xa1   :  { %v2501_v62 = vpop.permute.xlu1 %387  ;;  %v1242_v51 = vmul.f32 0.6931472, %v1996_v52  ;;  %v549_v52 = vsel %vm421_vm12, %v2267_v60, 0.0 }
  0xa2   :  { %465 = vmax.xlane.f32.xlu0 %v2505_v12  ;;  %vm424_vm4 = vcmp.eq.s32.totalorder %v2496_v37, %v2501_v62  ;;  %2007 = vlog2.f32 %v1207_v56 }
  0xa3   :  { %v2525_v30 = vpop.permute.xlu0 %390  ;;  %v1262_v50 = vmul.f32 %v1242_v51, %v2409_v27  ;;  %v1998_v17 = vpop.eup %1997  ;;  %v550_v27 = vsel %vm422_vm14, %v2292_v9, 0.0 }
  0xa4   :  { %437 = vmax.xlane.f32.xlu1 %v2517_v8  ;;  %v1240_v44 = vmul.f32 0.6931472, %v1998_v17 }
  0xa5   :  { %v2539_v39 = vpop.permute.xlu1 %393  ;;  %v2580_v46 = vsel %vm1267_vm13, %v1262_v50, 0.0 }
  0xa6   :  { %435 = vmax.xlane.f32.xlu0 %v2529_v35  ;;  %3713 = vst [vmem:[#allocation23_spill] sm:$0xff] %v2580_v46  ;;  %v1261_v50 = vmul.f32 %v1240_v44, %v2464_v15  ;;  %v552_v15 = vsel %vm424_vm4, %v2312_v24, 0.0  ;;  %vm426_vm8 = vcmp.eq.s32.totalorder %v2496_v37, %v2539_v39 }
  0xa7   :  { %v2560_v49 = vpop.permute.xlu0 %396 }
  0xa8   :  { %563 = vadd.xlane.f32.xlu1 %v547_v54  ;;  %v2558_v54 = vsel %vm1267_vm13, %v1260_v42, 0.0  ;;  %v2000_v42 = vpop.eup %1999  ;;  %v2610_v26 = vsel %vm1267_vm13, %v1261_v50, 0.0  ;;  %vm427_vm1 = vcmp.eq.s32.totalorder %v2496_v37, %v2560_v49 }
  0xa9   :  { %3712 = vst [vmem:[#allocation22_spill] sm:$0xff] %v2558_v54  ;;  %v2002_v40 = vpop.eup %2001  ;;  %v2585_v51 = vpop.permute.xlu1 %399  ;;  %v1244_v4 = vmul.f32 0.6931472, %v2000_v42  ;;  %3714 = vst [vmem:[#allocation24_spill] sm:$0xff] %v2610_v26 }
  0xaa   :  { %565 = vadd.xlane.f32.xlu0 %v548_v48  ;;  %v2577_v48 = vsel %vm225_vm10, %v257_v55, 1.0  ;;  %v2004_v55 = vpop.eup %2003  ;;  %v1246_v17 = vmul.f32 0.6931472, %v2002_v40  ;;  %vm425_vm10 = vcmp.eq.s32.totalorder %v2496_v37, %v2525_v30  ;;  %vm428_vm0 = vcmp.eq.s32.totalorder %v2496_v37, %v2585_v51 }
  0xab   :  { %v2006_v38 = vpop.eup %2005  ;;  %v1203_v34 = vadd.f32 1e-08, %v2577_v48  ;;  %v1263_v42 = vmul.f32 %v1244_v4, %v2468_v18  ;;  %v2607_v28 = vpop.permute.xlu0 %402  ;;  %v553_v5 = vsel %vm425_vm10, %v2321_v29, 0.0 }
  0xac   :  { %567 = vadd.xlane.f32.xlu1 %v549_v52  ;;  %v551_v52 = vsel %vm423_vm15, %v2288_v7, 0.0  ;;  %v1264_v40 = vmul.f32 %v1246_v17, %v2472_v19  ;;  %v1248_v44 = vmul.f32 0.6931472, %v2006_v38  ;;  %v259_v38 = vld [vmem:[%s3595_s1 + $0x10] sm:$0xff] }
  0xad   :  { %v2618_v18 = vsel %vm1267_vm13, %v1263_v42, 0.0  ;;  %v2634_v4 = vpop.permute.xlu1 %405  ;;  %2009 = vlog2.f32 %v1203_v34  ;;  %v2651_v50 = vsel %vm2261_vm2, %v259_v38, 1.0  ;;  %v555_v34 = vsel %vm427_vm1, %v2353_v47, 0.0  ;;  %v260_v42 = vld [vmem:[%s3595_s1 + $0x18] sm:$0xff] }
  0xae   :  { %569 = vadd.xlane.f32.xlu0 %v550_v27  ;;  %v1250_v27 = vmul.f32 0.6931472, %v2004_v55  ;;  %3715 = vst [vmem:[#allocation25_spill] sm:$0xff] %v2618_v18  ;;  %v2631_v19 = vsel %vm1267_vm13, %v1264_v40, 0.0  ;;  %v1265_v56 = vmul.f32 %v1248_v44, %v2510_v16  ;;  %v1204_v55 = vadd.f32 1e-08, %v2605_v32 }
  0xaf   :  { %3716 = vst [vmem:[#allocation26_spill] sm:$0xff] %v2631_v19  ;;  %v554_v16 = vsel %vm426_vm8, %v2342_v41, 0.0  ;;  %v2653_v17 = vpop.permute.xlu0 %408  ;;  %vm429_vm2 = vcmp.eq.s32.totalorder %v2496_v37, %v2607_v28  ;;  %v1205_v58 = vadd.f32 1e-08, %v2651_v50  ;;  %v556_v40 = vsel %vm428_vm0, %v2382_v3, 0.0 }
  0xb0   :  { %571 = vadd.xlane.f32.xlu1 %v551_v52  ;;  %v1266_v0 = vmul.f32 %v1250_v27, %v2476_v23  ;;  %v2643_v52 = vsel %vm1267_vm13, %v1265_v56, 0.0  ;;  %2011 = vlog2.f32 %v1204_v55  ;;  %v276_v44 = vsel %vm2269_vm3, %v260_v42, 1.0 }
  0xb1   :  { %3718 = vst [vmem:[#allocation28_spill] sm:$0xff] %v2643_v52  ;;  %v2667_v27 = vpop.permute.xlu1 %411  ;;  %vm430_vm9 = vcmp.eq.s32.totalorder %v2496_v37, %v2634_v4  ;;  %vm3617_vm11 = vcmp.eq.s32.totalorder %v2496_v37, %v2653_v17  ;;  %2013 = vlog2.f32 %v1205_v58  ;;  %v1206_v38 = vadd.f32 1e-08, %v276_v44  ;;  %v263_v58 = vld [vmem:[%s3595_s1 + $0x30] sm:$0xff] }
  0xb2   :  { %573 = vadd.xlane.f32.xlu0 %v552_v15  ;;  %v2639_v23 = vsel %vm1267_vm13, %v1266_v0, 0.0  ;;  %v557_v15 = vsel %vm429_vm2, %v2393_v13, 0.0  ;;  %v262_v0 = vld [vmem:[%s3595_s1 + $0x28] sm:$0xff]  ;;  %v558_v56 = vsel %vm430_vm9, %v2419_v33, 0.0  ;;  %vm432_vm3 = vcmp.eq.s32.totalorder %v2496_v37, %v2667_v27  ;;  %s2124_s1 = smov 126  }
  0xb3   :  { %3717 = vst [vmem:[#allocation27_spill] sm:$0xff] %v2639_v23  ;;  %v2686_v61 = vpop.permute.xlu0 %414  ;;  %v278_v55 = vsel %vm2294_vm5, %v262_v0, 1.0  ;;  %2015 = vlog2.f32 %v1206_v38 }
  0xb4   :  { %575 = vadd.xlane.f32.xlu1 %v553_v5  ;;  %v2008_v5 = vpop.eup %2007  ;;  %vm433_vm5 = vcmp.eq.s32.totalorder %v2496_v37, %v2686_v61  ;;  %v1208_v10 = vadd.f32 1e-08, %v278_v55 }
  0xb5   :  { %v1228_v42 = vmul.f32 0.6931472, %v2008_v5  ;;  %v279_v5 = vsel %vm2306_vm6, %v263_v58, 1.0 }
  0xb6   :  { %577 = vadd.xlane.f32.xlu0 %v554_v16  ;;  %2017 = vlog2.f32 %v1208_v10  ;;  %v1209_v21 = vadd.f32 1e-08, %v279_v5 }
  0xb7   :  { %v2010_v16 = vpop.eup %2009  ;;  %v1255_v38 = vmul.f32 %v1228_v42, %v2570_v57  ;;  %v1210_v42 = vadd.f32 1e-08, %v280_v20 }
  0xb8   :  { %579 = vadd.xlane.f32.xlu1 %v555_v34  ;;  %v559_v34 = vsel %vm3617_vm11, %v2437_v45, 0.0  ;;  %v1220_v0 = vmul.f32 0.6931472, %v2010_v16  ;;  %2019 = vlog2.f32 %v1209_v21 }
  0xb9   :  { %v1280_v57 = vsel %vm1267_vm13, %v1255_v38, 0.0  ;;  %2021 = vlog2.f32 %v1210_v42 }
  0xba   :  { %581 = vadd.xlane.f32.xlu0 %v556_v40  ;;  %v2703_v40 = vpop.permute.xlu1 %417  ;;  %v1251_v58 = vmul.f32 %v1220_v0, %v2577_v48 }
  0xbb   :  { %vm434_vm11 = vcmp.eq.s32.totalorder %v2496_v37, %v2703_v40 }
  0xbc   :  { %583 = vadd.xlane.f32.xlu1 %v557_v15  ;;  %v560_v15 = vsel %vm432_vm3, %v2458_v6, 0.0  ;;  %v562_v16 = vsel %vm434_vm11, %v2505_v12, 0.0  ;;  %v1268_v10 = vsel %vm1267_vm13, %v1251_v58, 0.0 }
  0xbe   :  { %585 = vadd.xlane.f32.xlu0 %v558_v56  ;;  %v2012_v56 = vpop.eup %2011 }
  0xbf   :  { %v2014_v14 = vpop.eup %2013 }
  0xc0   :  { %587 = vadd.xlane.f32.xlu1 %v559_v34  ;;  %v561_v34 = vsel %vm433_vm5, %v2486_v53, 0.0  ;;  %v1224_v2 = vmul.f32 0.6931472, %v2014_v14  ;;  %v2016_v1 = vpop.eup %2015 }
  0xc1   :  { %v1226_v22 = vmul.f32 0.6931472, %v2016_v1  ;;  %v2018_v0 = vpop.eup %2017 }
  0xc2   :  { %589 = vadd.xlane.f32.xlu0 %v560_v15  ;;  %v1222_v15 = vmul.f32 0.6931472, %v2012_v56  ;;  %v1253_v25 = vmul.f32 %v1224_v2, %v2651_v50  ;;  %v1230_v21 = vmul.f32 0.6931472, %v2018_v0 }
  0xc3   :  { %v1254_v38 = vmul.f32 %v1226_v22, %v276_v44 }
  0xc4   :  { %591 = vadd.xlane.f32.xlu1 %v561_v34  ;;  %v1252_v34 = vmul.f32 %v1222_v15, %v2605_v32  ;;  %v1274_v56 = vsel %vm1267_vm13, %v1253_v25, 0.0  ;;  %v1256_v32 = vmul.f32 %v1230_v21, %v278_v55 }
  0xc5   :  { %v1277_v58 = vsel %vm1267_vm13, %v1254_v38, 0.0 }
  0xc6   :  { %593 = vadd.xlane.f32.xlu0 %v562_v16  ;;  %v1271_v48 = vsel %vm1267_vm13, %v1252_v34, 0.0  ;;  %v2020_v16 = vpop.eup %2019 }
  0xc7   :  { %v1232_v14 = vmul.f32 0.6931472, %v2020_v16  ;;  %v2022_v15 = vpop.eup %2021 }
  0xc8   :  { %1281 = vadd.xlane.f32.xlu1 %v1280_v57  ;;  %v1283_v57 = vsel %vm1267_vm13, %v1256_v32, 0.0 }
  0xc9   :  { %v1257_v42 = vmul.f32 %v1232_v14, %v279_v5 }
  0xca   :  { %1269 = vadd.xlane.f32.xlu0 %v1268_v10  ;;  %v1234_v10 = vmul.f32 0.6931472, %v2022_v15 }
  0xcb   :  { %v1286_v1 = vsel %vm1267_vm13, %v1257_v42, 0.0 }
  0xcc   :  { %v1258_v2 = vmul.f32 %v1234_v10, %v280_v20 }
  0xce   :  { %1272 = vadd.xlane.f32.xlu0 %v1271_v48  ;;  %v1289_v50 = vsel %vm1267_vm13, %v1258_v2, 0.0 }
  0xd2   :  { %1275 = vadd.xlane.f32.xlu0 %v1274_v56 }
  0xd6   :  { %1278 = vadd.xlane.f32.xlu0 %v1277_v58 }
  0xda   :  { %1284 = vadd.xlane.f32.xlu0 %v1283_v57 }
  0xde   :  { %1287 = vadd.xlane.f32.xlu0 %v1286_v1 }
  0xe2   :  { %1290 = vadd.xlane.f32.xlu0 %v1289_v50 }
 0x113   :  { %v2740_v44 = vpop.xlane.xlu0 %439 }
 0x114   :  { %3719 = vst [vmem:[#allocation29_spill] sm:$0xff] %v2740_v44  ;;  %vm805_vm6 = vcmp.eq.f32.partialorder %v2267_v60, %v2740_v44 }
 0x115   :  { %v2745_v55 = vsel %vm805_vm6, %v2496_v37, 128 }
 0x116   :  { %v864_v34 = vshra.s32 %v2745_v55, 16 }
 0x117   :  { %v2748_v5 = vpop.xlane.xlu1 %443  ;;  %v2750_v48 = vpop.xlane.xlu0 %441 }
 0x118   :  { %3720 = vst [vmem:[#allocation30_spill] sm:$0xff] %v2748_v5  ;;  %3721 = vst [vmem:[#allocation31_spill] sm:$0xff] %v2750_v48  ;;  %v2752_v25 = vcvt.s32.f32 %v864_v34  ;;  %vm806_vm7 = vcmp.eq.f32.partialorder %v2292_v9, %v2750_v48  ;;  %vm807_vm13 = vcmp.eq.f32.partialorder %v2288_v7, %v2748_v5 }
 0x119   :  { %v2760_v20 = vsel %vm806_vm7, %v2496_v37, 128  ;;  %v2763_v22 = vsel %vm807_vm13, %v2496_v37, 128 }
 0x11a   :  { %867 = vmin.xlane.f32.xlu1 %v2752_v25  ;;  %v878_v56 = vshra.s32 %v2760_v20, 16  ;;  %v892_v38 = vshra.s32 %v2763_v22, 16 }
 0x11b   :  { %v2765_v0 = vpop.xlane.xlu0 %445 }
 0x11c   :  { %3722 = vst [vmem:[#allocation32_spill] sm:$0xff] %v2765_v0  ;;  %vm808_vm6 = vcmp.eq.f32.partialorder %v2312_v24, %v2765_v0  ;;  %v2773_v16 = vcvt.s32.f32 %v878_v56  ;;  %v2775_v58 = vcvt.s32.f32 %v892_v38 }
 0x11d   :  { %v2769_v21 = vpop.xlane.xlu1 %447  ;;  %v2778_v32 = vsel %vm808_vm6, %v2496_v37, 128 }
 0x11e   :  { %3723 = vst [vmem:[#allocation33_spill] sm:$0xff] %v2769_v21  ;;  %vm809_vm7 = vcmp.eq.f32.partialorder %v2321_v29, %v2769_v21  ;;  %881 = vmin.xlane.f32.xlu0 %v2773_v16  ;;  %895 = vmin.xlane.f32.xlu1 %v2775_v58  ;;  %v906_v15 = vshra.s32 %v2778_v32, 16 }
 0x11f   :  { %v2784_v14 = vpop.xlane.xlu0 %449  ;;  %v2788_v57 = vsel %vm809_vm7, %v2496_v37, 128 }
 0x120   :  { %3724 = vst [vmem:[#allocation34_spill] sm:$0xff] %v2784_v14  ;;  %v920_v10 = vshra.s32 %v2788_v57, 16  ;;  %v2793_v1 = vcvt.s32.f32 %v906_v15  ;;  %vm810_vm13 = vcmp.eq.f32.partialorder %v2342_v41, %v2784_v14 }
 0x121   :  { %v2790_v42 = vpop.xlane.xlu1 %451  ;;  %v2800_v50 = vsel %vm810_vm13, %v2496_v37, 128 }
 0x122   :  { %3725 = vst [vmem:[#allocation35_spill] sm:$0xff] %v2790_v42  ;;  %3726 = vst [vmem:[#allocation36_spill] sm:$0xff] %v2793_v1  ;;  %v2797_v2 = vcvt.s32.f32 %v920_v10  ;;  %vm811_vm6 = vcmp.eq.f32.partialorder %v2353_v47, %v2790_v42  ;;  %909 = vmin.xlane.f32.xlu0 %v2793_v1  ;;  %v934_v56 = vshra.s32 %v2800_v50, 16 }
 0x123   :  { %3728 = vst [vmem:[#allocation38_spill] sm:$0xff] %v2800_v50  ;;  %v2805_v34 = vpop.xlane.xlu0 %453  ;;  %v2809_v38 = vsel %vm811_vm6, %v2496_v37, 128 }
 0x124   :  { %3727 = vst [vmem:[#allocation37_spill] sm:$0xff] %v2797_v2  ;;  %3729 = vst [vmem:[#allocation39_spill] sm:$0xff] %v2805_v34  ;;  %923 = vmin.xlane.f32.xlu1 %v2797_v2  ;;  %v948_v10 = vshra.s32 %v2809_v38, 16  ;;  %v2815_v52 = vcvt.s32.f32 %v934_v56  ;;  %vm812_vm7 = vcmp.eq.f32.partialorder %v2382_v3, %v2805_v34 }
 0x125   :  { %3730 = vst [vmem:[#allocation40_spill] sm:$0xff] %v2809_v38  ;;  %v2812_v15 = vpop.xlane.xlu1 %455  ;;  %v2822_v19 = vsel %vm812_vm7, %v2496_v37, 128 }
 0x126   :  { %3731 = vst [vmem:[#allocation41_spill] sm:$0xff] %v2812_v15  ;;  %3732 = vst [vmem:[#allocation42_spill] sm:$0xff] %v2815_v52  ;;  %v2819_v23 = vcvt.s32.f32 %v948_v10  ;;  %vm813_vm13 = vcmp.eq.f32.partialorder %v2393_v13, %v2812_v15  ;;  %937 = vmin.xlane.f32.xlu0 %v2815_v52  ;;  %v962_v26 = vshra.s32 %v2822_v19, 16  ;;  %v469_v52 = vsub.f32 %v2267_v60, %v2740_v44 }
 0x127   :  { %3734 = vst [vmem:[#allocation44_spill] sm:$0xff] %v2822_v19  ;;  %v2827_v18 = vpop.xlane.xlu0 %457  ;;  %v2831_v56 = vsel %vm813_vm13, %v2496_v37, 128  ;;  %v470_v60 = vsub.f32 %v2292_v9, %v2750_v48  ;;  %v471_v9 = vsub.f32 %v2288_v7, %v2748_v5 }
 0x128   :  { %3733 = vst [vmem:[#allocation43_spill] sm:$0xff] %v2819_v23  ;;  %3735 = vst [vmem:[#allocation45_spill] sm:$0xff] %v2827_v18  ;;  %951 = vmin.xlane.f32.xlu1 %v2819_v23  ;;  %v976_v10 = vshra.s32 %v2831_v56, 16  ;;  %v2837_v54 = vcvt.s32.f32 %v962_v26  ;;  %vm814_vm6 = vcmp.eq.f32.partialorder %v2419_v33, %v2827_v18 }
 0x129   :  { %3736 = vst [vmem:[#allocation46_spill] sm:$0xff] %v2831_v56  ;;  %v2834_v46 = vpop.xlane.xlu1 %459  ;;  %v2846_v19 = vsel %vm814_vm6, %v2496_v37, 128 }
 0x12a   :  { %3737 = vst [vmem:[#allocation47_spill] sm:$0xff] %v2834_v46  ;;  %3738 = vst [vmem:[#allocation48_spill] sm:$0xff] %v2837_v54  ;;  %v2843_v2 = vcvt.s32.f32 %v976_v10  ;;  %vm815_vm7 = vcmp.eq.f32.partialorder %v2437_v45, %v2834_v46  ;;  %965 = vmin.xlane.f32.xlu0 %v2837_v54  ;;  %v990_v26 = vshra.s32 %v2846_v19, 16  ;;  %v487_v54 = vmul.f32 1.442695, %v469_v52 }
 0x12b   :  { %3740 = vst [vmem:[#allocation50_spill] sm:$0xff] %v2846_v19  ;;  %v2851_v23 = vpop.xlane.xlu0 %461  ;;  %v2855_v56 = vsel %vm815_vm7, %v2496_v37, 128  ;;  %v489_v52 = vmul.f32 1.442695, %v470_v60  ;;  %v473_v60 = vsub.f32 %v2321_v29, %v2769_v21 }
 0x12c   :  { %3739 = vst [vmem:[#allocation49_spill] sm:$0xff] %v2843_v2  ;;  %3741 = vst [vmem:[#allocation51_spill] sm:$0xff] %v2851_v23  ;;  %979 = vmin.xlane.f32.xlu1 %v2843_v2  ;;  %v1004_v44 = vshra.s32 %v2855_v56, 16  ;;  %v2863_v1 = vcvt.s32.f32 %v990_v26  ;;  %vm816_vm13 = vcmp.eq.f32.partialorder %v2458_v6, %v2851_v23  ;;  %2023 = vpow2.f32 %v487_v54 }
 0x12d   :  { %3742 = vst [vmem:[#allocation52_spill] sm:$0xff] %v2855_v56  ;;  %v2860_v10 = vpop.xlane.xlu1 %463  ;;  %v2870_v19 = vsel %vm816_vm13, %v2496_v37, 128  ;;  %2025 = vpow2.f32 %v489_v52  ;;  %v475_v52 = vsub.f32 %v2353_v47, %v2790_v42 }
 0x12e   :  { %3743 = vst [vmem:[#allocation53_spill] sm:$0xff] %v2860_v10  ;;  %3744 = vst [vmem:[#allocation54_spill] sm:$0xff] %v2863_v1  ;;  %v2867_v38 = vcvt.s32.f32 %v1004_v44  ;;  %vm817_vm6 = vcmp.eq.f32.partialorder %v2486_v53, %v2860_v10  ;;  %993 = vmin.xlane.f32.xlu0 %v2863_v1  ;;  %v1018_v26 = vshra.s32 %v2870_v19, 16  ;;  %v472_v44 = vsub.f32 %v2312_v24, %v2765_v0 }
 0x12f   :  { %v2877_v48 = vpop.xlane.xlu0 %465  ;;  %v2881_v2 = vsel %vm817_vm6, %v2496_v37, 128  ;;  %v491_v24 = vmul.f32 1.442695, %v471_v9 }
 0x130   :  { %3745 = vst [vmem:[#allocation55_spill] sm:$0xff] %v2867_v38  ;;  %3746 = vst [vmem:[#allocation56_spill] sm:$0xff] %v2877_v48  ;;  %1007 = vmin.xlane.f32.xlu1 %v2867_v38  ;;  %v1032_v50 = vshra.s32 %v2881_v2, 16  ;;  %v2889_v7 = vcvt.s32.f32 %v1018_v26  ;;  %vm818_vm7 = vcmp.eq.f32.partialorder %v2505_v12, %v2877_v48  ;;  %v474_v38 = vsub.f32 %v2342_v41, %v2784_v14 }
 0x131   :  { %v2886_v56 = vpop.xlane.xlu1 %437  ;;  %v2896_v1 = vsel %vm818_vm7, %v2496_v37, 128  ;;  %2027 = vpow2.f32 %v491_v24  ;;  %v477_v24 = vsub.f32 %v2393_v13, %v2812_v15 }
 0x132   :  { %3747 = vst [vmem:[#allocation57_spill] sm:$0xff] %v2889_v7  ;;  %v2893_v5 = vcvt.s32.f32 %v1032_v50  ;;  %vm804_vm13 = vcmp.eq.f32.partialorder %v2517_v8, %v2886_v56  ;;  %1021 = vmin.xlane.f32.xlu0 %v2889_v7  ;;  %v1046_v0 = vshra.s32 %v2896_v1, 16  ;;  %v493_v50 = vmul.f32 1.442695, %v472_v44 }
 0x133   :  { %v2903_v26 = vpop.xlane.xlu0 %435  ;;  %v2907_v54 = vsel %vm804_vm13, %v2496_v37, 128  ;;  %v495_v7 = vmul.f32 1.442695, %v473_v60  ;;  %v476_v44 = vsub.f32 %v2382_v3, %v2805_v34  ;;  %v468_v62 = vsub.f32 %v2517_v8, %v2886_v56 }
 0x134   :  { %3748 = vst [vmem:[#allocation58_spill] sm:$0xff] %v2893_v5  ;;  %3749 = vst [vmem:[#allocation59_spill] sm:$0xff] %v2907_v54  ;;  %1035 = vmin.xlane.f32.xlu1 %v2893_v5  ;;  %v2912_v9 = vcvt.s32.f32 %v1046_v0  ;;  %v850_v29 = vshra.s32 %v2907_v54, 16  ;;  %vm803_vm6 = vcmp.eq.f32.partialorder %v2529_v35, %v2903_v26  ;;  %2029 = vpow2.f32 %v493_v50 }
 0x135   :  { %v2918_v21 = vsel %vm803_vm6, %v2496_v37, 128  ;;  %v497_v0 = vmul.f32 1.442695, %v474_v38  ;;  %2031 = vpow2.f32 %v495_v7  ;;  %v499_v5 = vmul.f32 1.442695, %v475_v52 }
 0x136   :  { %1049 = vmin.xlane.f32.xlu0 %v2912_v9  ;;  %v836_v41 = vshra.s32 %v2918_v21, 16  ;;  %v2926_v14 = vcvt.s32.f32 %v850_v29  ;;  %v2024_v47 = vpop.eup %2023  ;;  %v501_v60 = vmul.f32 1.442695, %v476_v44  ;;  %v478_v38 = vsub.f32 %v2419_v33, %v2827_v18  ;;  %v3797_v18 = vld [vmem:[#allocation29_spill] sm:$0xff] }
 0x137   :  { %2033 = vpow2.f32 %v497_v0  ;;  %v2026_v3 = vpop.eup %2025  ;;  %v503_v50 = vmul.f32 1.442695, %v477_v24  ;;  %v479_v7 = vsub.f32 %v2437_v45, %v2834_v46  ;;  %v480_v29 = vsub.f32 %v2458_v6, %v2851_v23  ;;  %v3795_v46 = vld [vmem:[#allocation3_spill] sm:$0xff] }
 0x138   :  { %v2928_v54 = vcvt.s32.f32 %v836_v41  ;;  %2035 = vpow2.f32 %v499_v5  ;;  %v505_v13 = vmul.f32 1.442695, %v478_v38  ;;  %v481_v33 = vsub.f32 %v2486_v53, %v2860_v10 }
 0x139   :  { %2037 = vpow2.f32 %v501_v60  ;;  %v507_v0 = vmul.f32 1.442695, %v479_v7  ;;  %v509_v5 = vmul.f32 1.442695, %v480_v29  ;;  %v482_v45 = vsub.f32 %v2505_v12, %v2877_v48  ;;  %v2944_v29 = vpop.xlane.xlu0 %565 }
 0x13a   :  { %853 = vmin.xlane.f32.xlu0 %v2926_v14  ;;  %839 = vmin.xlane.f32.xlu1 %v2928_v54  ;;  %2039 = vpow2.f32 %v503_v50  ;;  %v511_v60 = vmul.f32 1.442695, %v481_v33  ;;  %v467_v36 = vsub.f32 %v2529_v35, %v2903_v26  ;;  %v485_v30 = vmul.f32 1.442695, %v468_v62 }
 0x13b   :  { %v2028_v52 = vpop.eup %2027  ;;  %2041 = vpow2.f32 %v505_v13  ;;  %v513_v6 = vmul.f32 1.442695, %v482_v45  ;;  %v598_v45 = vsel %vm422_vm14, %v2026_v3, 0.0 }
 0x13c   :  { %2043 = vpow2.f32 %v507_v0  ;;  %v599_v10 = vsel %vm423_vm15, %v2028_v52, 0.0 }
 0x13d   :  { %2045 = vpow2.f32 %v509_v5  ;;  %v2946_v5 = vpop.xlane.xlu0 %569 }
 0x13e   :  { %521 = vadd.xlane.f32.xlu0 %v2026_v3  ;;  %519 = vadd.xlane.f32.xlu1 %v2024_v47  ;;  %v2030_v41 = vpop.eup %2029  ;;  %2047 = vpow2.f32 %v511_v60  ;;  %v597_v60 = vsel %vm421_vm12, %v2024_v47, 0.0  ;;  %v483_v3 = vmul.f32 1.442695, %v467_v36  ;;  %v877_v36 = vand.u32 65535, %v2760_v20 }
 0x13f   :  { %v2032_v44 = vpop.eup %2031  ;;  %2049 = vpow2.f32 %v513_v6  ;;  %v600_v6 = vsel %vm424_vm4, %v2030_v41, 0.0 }
 0x140   :  { %v601_v31 = vsel %vm425_vm10, %v2032_v44, 0.0  ;;  %2051 = vpow2.f32 %v485_v30 }
 0x141   :  { %v2034_v24 = vpop.eup %2033  ;;  %v2960_v23 = vpop.xlane.xlu0 %573  ;;  %2053 = vpow2.f32 %v483_v3  ;;  %v905_v3 = vand.u32 65535, %v2778_v32 }
 0x142   :  { %525 = vadd.xlane.f32.xlu0 %v2030_v41  ;;  %523 = vadd.xlane.f32.xlu1 %v2028_v52  ;;  %v2036_v38 = vpop.eup %2035  ;;  %v602_v11 = vsel %vm426_vm8, %v2034_v24, 0.0 }
 0x143   :  { %v2038_v50 = vpop.eup %2037  ;;  %v603_v39 = vsel %vm427_vm1, %v2036_v38, 0.0  ;;  %vm3755_vm1 = vcmp.eq.s32.totalorder %v2496_v37, %v2432_v43 }
 0x144   :  { %v2040_v53 = vpop.eup %2039 }
 0x145   :  { %v2042_v7 = vpop.eup %2041  ;;  %v2972_v47 = vpop.xlane.xlu0 %577  ;;  %v605_v35 = vsel %vm429_vm2, %v2040_v53, 0.0 }
 0x146   :  { %529 = vadd.xlane.f32.xlu0 %v2034_v24  ;;  %527 = vadd.xlane.f32.xlu1 %v2032_v44  ;;  %v2044_v13 = vpop.eup %2043  ;;  %3750 = vst [vmem:[#allocation60_spill] sm:$0xff] %v2972_v47  ;;  %v606_v8 = vsel %vm430_vm9, %v2042_v7, 0.0  ;;  %v3002_v44 = vpop.xlane.xlu1 %563  ;;  %vm3756_vm9 = vcmp.eq.s32.totalorder %v2496_v37, %v2378_v63 }
 0x147   :  { %v2046_v12 = vpop.eup %2045 }
 0x148   :  { %v2048_v0 = vpop.eup %2047  ;;  %v608_v49 = vsel %vm432_vm3, %v2046_v12, 0.0 }
 0x149   :  { %v2050_v33 = vpop.eup %2049  ;;  %v2986_v51 = vpop.xlane.xlu0 %581  ;;  %v609_v41 = vsel %vm433_vm5, %v2048_v0, 0.0 }
 0x14a   :  { %533 = vadd.xlane.f32.xlu0 %v2038_v50  ;;  %531 = vadd.xlane.f32.xlu1 %v2036_v38  ;;  %3751 = vst [vmem:[#allocation61_spill] sm:$0xff] %v2986_v51  ;;  %v610_v28 = vsel %vm434_vm11, %v2050_v33, 0.0  ;;  %v2052_v27 = vpop.eup %2051  ;;  %v3006_v38 = vpop.xlane.xlu1 %567 }
 0x14b   :  { %v2054_v24 = vpop.eup %2053  ;;  %v596_v40 = vsel %vm3755_vm1, %v2052_v27, 0.0 }
 0x14c   :  { %v595_v61 = vsel %vm3756_vm9, %v2054_v24, 0.0 }
 0x14d   :  { %v2994_v4 = vpop.xlane.xlu0 %585 }
 0x14e   :  { %537 = vadd.xlane.f32.xlu0 %v2042_v7  ;;  %535 = vadd.xlane.f32.xlu1 %v2040_v53  ;;  %3753 = vst [vmem:[#allocation62_spill] sm:$0xff] %v2994_v4  ;;  %v3016_v53 = vpop.xlane.xlu1 %571 }
 0x152   :  { %541 = vadd.xlane.f32.xlu0 %v2046_v12  ;;  %539 = vadd.xlane.f32.xlu1 %v2044_v13 }
 0x156   :  { %545 = vadd.xlane.f32.xlu0 %v2050_v33  ;;  %543 = vadd.xlane.f32.xlu1 %v2048_v0 }
 0x15a   :  { %617 = vadd.xlane.f32.xlu0 %v598_v45  ;;  %615 = vadd.xlane.f32.xlu1 %v597_v60 }
 0x15e   :  { %621 = vadd.xlane.f32.xlu0 %v600_v6  ;;  %619 = vadd.xlane.f32.xlu1 %v599_v10  ;;  %v604_v10 = vsel %vm428_vm0, %v2038_v50, 0.0  ;;  %vm3752_vm0 = vcmp.eq.s32.totalorder %v2496_v37, %v2653_v17  ;;  %v3004_v17 = vpop.xlane.xlu0 %589  ;;  %v863_v6 = vand.u32 65535, %v2745_v55 }
 0x15f   :  { %v607_v52 = vsel %vm3752_vm0, %v2044_v13, 0.0  ;;  %3754 = vst [vmem:[#allocation63_spill] sm:$0xff] %v3004_v17  ;;  %v3021_v13 = vpop.xlane.xlu1 %575  ;;  %v3658_v17 = vmov 0.0  }
 0x160   :  { %v865_v62 = vcvt.s32.f32 %v863_v6 }
 0x162   :  { %625 = vadd.xlane.f32.xlu0 %v602_v11  ;;  %623 = vadd.xlane.f32.xlu1 %v601_v31  ;;  %v3014_v50 = vpop.xlane.xlu0 %593 }
 0x163   :  { %3757 = vst [vmem:[#allocation64_spill] sm:$0xff] %v3014_v50  ;;  %v3025_v43 = vpop.xlane.xlu1 %579  ;;  %v3793_v50 = vld [vmem:[#allocation2_spill] sm:$0xff] }
 0x164   :  { %3758 = vst [vmem:[#allocation65_spill] sm:$0xff] %v3025_v43 }
 0x166   :  { %629 = vadd.xlane.f32.xlu0 %v604_v10  ;;  %627 = vadd.xlane.f32.xlu1 %v603_v39  ;;  %v3019_v7 = vpop.xlane.xlu0 %1269  ;;  %v891_v10 = vand.u32 65535, %v2763_v22  ;;  %v3764_v22 = vld [vmem:[#allocation38_spill] sm:$0xff] }
 0x167   :  { %v3029_v63 = vpop.xlane.xlu1 %583  ;;  %v933_v32 = vand.u32 65535, %v3764_v22  ;;  %v3771_v22 = vld [vmem:[#allocation43_spill] sm:$0xff] }
 0x168   :  { %3759 = vst [vmem:[#allocation66_spill] sm:$0xff] %v3029_v63 }
 0x16a   :  { %633 = vadd.xlane.f32.xlu0 %v606_v8  ;;  %631 = vadd.xlane.f32.xlu1 %v605_v35  ;;  %v3023_v12 = vpop.xlane.xlu0 %1272  ;;  %v879_v35 = vcvt.s32.f32 %v877_v36 }
 0x16b   :  { %v3033_v33 = vpop.xlane.xlu1 %587  ;;  %v1317_v48 = vsub.f32 0.0, %v3023_v12 }
 0x16c   :  { %3760 = vst [vmem:[#allocation67_spill] sm:$0xff] %v3033_v33 }
 0x16e   :  { %637 = vadd.xlane.f32.xlu0 %v608_v49  ;;  %635 = vadd.xlane.f32.xlu1 %v607_v52  ;;  %v3027_v0 = vpop.xlane.xlu0 %1275  ;;  %v893_v49 = vcvt.s32.f32 %v891_v10  ;;  %v919_v52 = vand.u32 65535, %v2788_v57  ;;  %v3766_v57 = vld [vmem:[#allocation36_spill] sm:$0xff] }
 0x16f   :  { %v3037_v60 = vpop.xlane.xlu1 %591 }
 0x170   :  { %3762 = vst [vmem:[#allocation69_spill] sm:$0xff] %v3037_v60  ;;  %v1316_v60 = vsub.f32 0.0, %v3019_v7 }
 0x172   :  { %641 = vadd.xlane.f32.xlu0 %v610_v28  ;;  %639 = vadd.xlane.f32.xlu1 %v609_v41  ;;  %v3031_v37 = vpop.xlane.xlu0 %1278  ;;  %v907_v41 = vcvt.s32.f32 %v905_v3  ;;  %v3769_v3 = vld [vmem:[#allocation46_spill] sm:$0xff] }
 0x173   :  { %v3042_v11 = vpop.xlane.xlu1 %1281 }
 0x176   :  { %517 = vadd.xlane.f32.xlu0 %v2052_v27  ;;  %515 = vadd.xlane.f32.xlu1 %v2054_v24  ;;  %v3035_v45 = vpop.xlane.xlu0 %1284  ;;  %v3765_v27 = vld [vmem:[#allocation40_spill] sm:$0xff] }
 0x177   :  { %3761 = vst [vmem:[#allocation68_spill] sm:$0xff] %v3035_v45  ;;  %v947_v24 = vand.u32 65535, %v3765_v27  ;;  %v3772_v27 = vld [vmem:[#allocation50_spill] sm:$0xff] }
 0x17a   :  { %613 = vadd.xlane.f32.xlu0 %v596_v40  ;;  %611 = vadd.xlane.f32.xlu1 %v595_v61 }
 0x17e   :  { %1293 = vadd.xlane.f32.xlu0 %v2548_v59  ;;  %v3039_v59 = vpop.xlane.xlu0 %1287 }
 0x182   :  { %v3048_v39 = vpop.xlane.xlu0 %1290 }
 0x183   :  { %3763 = vst [vmem:[#allocation70_spill] sm:$0xff] %v3048_v39 }
 0x1a7   :  { %v3044_v31 = vpop.xlane.xlu1 %867 }
 0x1a8   :  { %vm869_vm11 = vcmp.eq.f32.partialorder %v2752_v25, %v3044_v31 }
 0x1a9   :  { %v870_v30 = vsel %vm869_vm11, %v865_v62, inf  ;;  %v3768_v62 = vld [vmem:[#allocation44_spill] sm:$0xff]  ;;  %vm3794_vm11 = vcmp.gt.f32.partialorder %v3793_v50, 0.5  ;;  %v1318_v50 = vsub.f32 0.0, %v3027_v0 }
 0x1aa   :  { %871 = vmin.xlane.f32.xlu0 %v870_v30  ;;  %v961_v36 = vand.u32 65535, %v3768_v62  ;;  %v935_v30 = vcvt.s32.f32 %v933_v32  ;;  %v3774_v62 = vld [vmem:[#allocation48_spill] sm:$0xff] }
 0x1ab   :  { %v3053_v8 = vpop.xlane.xlu0 %881  ;;  %v3055_v55 = vpop.xlane.xlu1 %895 }
 0x1ac   :  { %vm883_vm12 = vcmp.eq.f32.partialorder %v2773_v16, %v3053_v8  ;;  %vm897_vm14 = vcmp.eq.f32.partialorder %v2775_v58, %v3055_v55  ;;  %v921_v16 = vcvt.s32.f32 %v919_v52  ;;  %v3767_v58 = vld [vmem:[#allocation37_spill] sm:$0xff]  ;;  %v949_v52 = vcvt.s32.f32 %v947_v24 }
 0x1ad   :  { %v884_v20 = vsel %vm883_vm12, %v879_v35, inf  ;;  %v898_v25 = vsel %vm897_vm14, %v893_v49, inf  ;;  %v975_v35 = vand.u32 65535, %v3769_v3  ;;  %v963_v32 = vcvt.s32.f32 %v961_v36  ;;  %v3775_v3 = vld [vmem:[#allocation49_spill] sm:$0xff] }
 0x1ae   :  { %885 = vmin.xlane.f32.xlu1 %v884_v20  ;;  %899 = vmin.xlane.f32.xlu0 %v898_v25  ;;  %v3770_v20 = vld [vmem:[#allocation42_spill] sm:$0xff]  ;;  %vm3796_vm12 = vcmp.gt.f32.partialorder %v3795_v46, 0.5 }
 0x1af   :  { %v3063_v28 = vpop.xlane.xlu0 %909  ;;  %v977_v24 = vcvt.s32.f32 %v975_v35 }
 0x1b0   :  { %vm911_vm15 = vcmp.eq.f32.partialorder %v3766_v57, %v3063_v28  ;;  %v989_v57 = vand.u32 65535, %v3772_v27  ;;  %v3776_v27 = vld [vmem:[#allocation54_spill] sm:$0xff] }
 0x1b1   :  { %v3066_v40 = vpop.xlane.xlu1 %923  ;;  %v912_v61 = vsel %vm911_vm15, %v907_v41, inf }
 0x1b2   :  { %vm925_vm4 = vcmp.eq.f32.partialorder %v3767_v58, %v3066_v40  ;;  %913 = vmin.xlane.f32.xlu1 %v912_v61  ;;  %v3773_v61 = vld [vmem:[#allocation52_spill] sm:$0xff]  ;;  %v991_v36 = vcvt.s32.f32 %v989_v57 }
 0x1b3   :  { %v926_v6 = vsel %vm925_vm4, %v921_v16, inf  ;;  %v3073_v10 = vpop.xlane.xlu0 %937  ;;  %v1003_v58 = vand.u32 65535, %v3773_v61  ;;  %v3777_v61 = vld [vmem:[#allocation55_spill] sm:$0xff] }
 0x1b4   :  { %927 = vmin.xlane.f32.xlu0 %v926_v6  ;;  %vm939_vm10 = vcmp.eq.f32.partialorder %v3770_v20, %v3073_v10 }
 0x1b5   :  { %v3076_v49 = vpop.xlane.xlu1 %951  ;;  %v940_v25 = vsel %vm939_vm10, %v935_v30, inf  ;;  %v1005_v35 = vcvt.s32.f32 %v1003_v58  ;;  %v3779_v58 = vld [vmem:[#allocation58_spill] sm:$0xff] }
 0x1b6   :  { %vm953_vm8 = vcmp.eq.f32.partialorder %v3771_v22, %v3076_v49  ;;  %941 = vmin.xlane.f32.xlu1 %v940_v25  ;;  %v1031_v22 = vand.u32 65535, %v2881_v2  ;;  %v3778_v2 = vld [vmem:[#allocation57_spill] sm:$0xff] }
 0x1b7   :  { %v954_v41 = vsel %vm953_vm8, %v949_v52, inf  ;;  %v3083_v16 = vpop.xlane.xlu0 %965  ;;  %v1017_v52 = vand.u32 65535, %v2870_v19  ;;  %v1045_v19 = vand.u32 65535, %v2896_v1  ;;  %v835_v1 = vand.u32 65535, %v2918_v21 }
 0x1b8   :  { %955 = vmin.xlane.f32.xlu0 %v954_v41  ;;  %vm967_vm2 = vcmp.eq.f32.partialorder %v3774_v62, %v3083_v16 }
 0x1b9   :  { %v3086_v6 = vpop.xlane.xlu1 %979  ;;  %v968_v30 = vsel %vm967_vm2, %v963_v32, inf  ;;  %v1019_v57 = vcvt.s32.f32 %v1017_v52  ;;  %v1047_v52 = vcvt.s32.f32 %v1045_v19 }
 0x1ba   :  { %vm981_vm3 = vcmp.eq.f32.partialorder %v3775_v3, %v3086_v6  ;;  %969 = vmin.xlane.f32.xlu1 %v968_v30  ;;  %v1033_v3 = vcvt.s32.f32 %v1031_v22 }
 0x1bb   :  { %v982_v20 = vsel %vm981_vm3, %v977_v24, inf  ;;  %v3093_v25 = vpop.xlane.xlu0 %993 }
 0x1bc   :  { %983 = vmin.xlane.f32.xlu0 %v982_v20  ;;  %vm995_vm5 = vcmp.eq.f32.partialorder %v3776_v27, %v3093_v25  ;;  %v3780_v27 = vld [vmem:[#allocation59_spill] sm:$0xff] }
 0x1bd   :  { %v3096_v41 = vpop.xlane.xlu1 %1007  ;;  %v996_v32 = vsel %vm995_vm5, %v991_v36, inf }
 0x1be   :  { %vm1009_vm7 = vcmp.eq.f32.partialorder %v3777_v61, %v3096_v41  ;;  %997 = vmin.xlane.f32.xlu1 %v996_v32 }
 0x1bf   :  { %v1010_v62 = vsel %vm1009_vm7, %v1005_v35, inf  ;;  %v3103_v24 = vpop.xlane.xlu0 %1021  ;;  %v849_v35 = vand.u32 65535, %v3780_v27 }
 0x1c0   :  { %1011 = vmin.xlane.f32.xlu0 %v1010_v62  ;;  %vm1023_vm13 = vcmp.eq.f32.partialorder %v3778_v2, %v3103_v24  ;;  %v837_v2 = vcvt.s32.f32 %v835_v1 }
 0x1c1   :  { %v3105_v30 = vpop.xlane.xlu1 %1035  ;;  %v1024_v20 = vsel %vm1023_vm13, %v1019_v57, inf  ;;  %v851_v57 = vcvt.s32.f32 %v849_v35  ;;  %v3783_v35 = vld [vmem:[#allocation24_spill] sm:$0xff] }
 0x1c2   :  { %vm1037_vm6 = vcmp.eq.f32.partialorder %v3779_v58, %v3105_v30  ;;  %1025 = vmin.xlane.f32.xlu1 %v1024_v20  ;;  %v3781_v20 = vld [vmem:[#allocation22_spill] sm:$0xff]  ;;  %v3782_v58 = vld [vmem:[#allocation23_spill] sm:$0xff] }
 0x1c3   :  { %v1038_v36 = vsel %vm1037_vm6, %v1033_v3, inf  ;;  %v3113_v32 = vpop.xlane.xlu0 %1049 }
 0x1c4   :  { %1039 = vmin.xlane.f32.xlu0 %v1038_v36  ;;  %vm1051_vm0 = vcmp.eq.f32.partialorder %v2912_v9, %v3113_v32 }
 0x1c5   :  { %v1052_v61 = vsel %vm1051_vm0, %v1047_v52, inf  ;;  %v3785_v52 = vld [vmem:[#allocation26_spill] sm:$0xff] }
 0x1c6   :  { %1053 = vmin.xlane.f32.xlu1 %v1052_v61  ;;  %v3786_v61 = vld [vmem:[#allocation27_spill] sm:$0xff] }
 0x1c7   :  { %v3117_v22 = vpop.xlane.xlu0 %853  ;;  %v3119_v62 = vpop.xlane.xlu1 %839 }
 0x1c8   :  { %vm855_vm1 = vcmp.eq.f32.partialorder %v2926_v14, %v3117_v22  ;;  %vm841_vm9 = vcmp.eq.f32.partialorder %v2928_v54, %v3119_v62  ;;  %v3784_v14 = vld [vmem:[#allocation25_spill] sm:$0xff] }
 0x1c9   :  { %v856_v21 = vsel %vm855_vm1, %v851_v57, inf  ;;  %v842_v3 = vsel %vm841_vm9, %v837_v2, inf }
 0x1ca   :  { %857 = vmin.xlane.f32.xlu1 %v856_v21  ;;  %843 = vmin.xlane.f32.xlu0 %v842_v3  ;;  %v3787_v21 = vld [vmem:[#allocation28_spill] sm:$0xff] }
 0x1cb   :  { %v3125_v19 = vpop.xlane.xlu0 %521  ;;  %v520_v9 = vpop.xlane.xlu1 %519 }
 0x1cc   :  { %2055 = vlog2.f32 %v520_v9 }
 0x1cd   :  { %2057 = vrcp.f32 %v520_v9 }
 0x1ce   :  { %1296 = vadd.xlane.f32.xlu1 %v3781_v20  ;;  %1302 = vadd.xlane.f32.xlu0 %v3782_v58 }
 0x1cf   :  { %v3129_v36 = vpop.xlane.xlu0 %525  ;;  %v3131_v27 = vpop.xlane.xlu1 %523 }
 0x1d2   :  { %1299 = vadd.xlane.f32.xlu1 %v3783_v35  ;;  %1305 = vadd.xlane.f32.xlu0 %v3784_v14 }
 0x1d3   :  { %v3135_v54 = vpop.xlane.xlu0 %529  ;;  %v3137_v1 = vpop.xlane.xlu1 %527 }
 0x1d6   :  { %1308 = vadd.xlane.f32.xlu1 %v3785_v52  ;;  %1314 = vadd.xlane.f32.xlu0 %v3786_v61  ;;  %v2056_v14 = vpop.eup %2055 }
 0x1d7   :  { %v3141_v57 = vpop.xlane.xlu0 %533  ;;  %v3143_v2 = vpop.xlane.xlu1 %531  ;;  %v648_v9 = vmul.f32 0.6931472, %v2056_v14 }
 0x1d8   :  { %v2058_v33 = vpop.eup %2057 }
 0x1d9   :  { %v677_v43 = vadd.f32 %v648_v9, %v3797_v18 }
 0x1da   :  { %1311 = vadd.xlane.f32.xlu1 %v3787_v21  ;;  %v3162_v21 = vsel %vm3794_vm11, 1.0, %v3658_v17 }
 0x1db   :  { %v3146_v3 = vpop.xlane.xlu0 %537  ;;  %v3148_v20 = vpop.xlane.xlu1 %535  ;;  %v1575_v7 = vmul.f32 %v3162_v21, %v1316_v60  ;;  %v1577_v60 = vmul.f32 0.0, %v1318_v50 }
 0x1dc   :  { %3788 = vst [vmem:[#allocation38_spill] sm:$0xff] %v3146_v3 }
 0x1df   :  { %v3150_v58 = vpop.xlane.xlu0 %541  ;;  %v3152_v35 = vpop.xlane.xlu1 %539 }
 0x1e0   :  { %3789 = vst [vmem:[#allocation40_spill] sm:$0xff] %v3150_v58  ;;  %3790 = vst [vmem:[#allocation36_spill] sm:$0xff] %v3152_v35  ;;  %v3168_v58 = vsel %vm3796_vm12, 1.0, %v3658_v17 }
 0x1e1   :  { %v1576_v4 = vmul.f32 %v3168_v58, %v1317_v48  ;;  %v1916_v46 = vpack.i.bf16 %v3168_v58, %v3162_v21  ;;  %v693_v48 = vsub.f32 %v677_v43, %v3006_v38 }
 0x1e3   :  { %v3154_v52 = vpop.xlane.xlu0 %545  ;;  %v3156_v61 = vpop.xlane.xlu1 %543 }
 0x1e4   :  { %3791 = vst [vmem:[#allocation37_spill] sm:$0xff] %v3154_v52  ;;  %3792 = vst [vmem:[#allocation44_spill] sm:$0xff] %v3156_v61 }
 0x1e7   :  { %v3170_v52 = vpop.xlane.xlu0 %617  ;;  %v616_v61 = vpop.xlane.xlu1 %615 }
 0x1e8   :  { %v712_v35 = vmul.f32 %v2058_v33, %v616_v61 }
 0x1ea   :  { %v741_v12 = vsub.f32 1.0, %v712_v35 }
 0x1eb   :  { %v3176_v14 = vpop.xlane.xlu0 %621  ;;  %1607 = vrot.lane.b32.xlu1 %v1575_v7, %s2124_s1  ;;  %v3179_v17 = vpop.xlane.xlu1 %619 }
 0x1ec   :  { %v757_v33 = vmul.f32 0.25, %v741_v12  ;;  %1609 = vrot.lane.b32.xlu0 %v1576_v4, %s2124_s1 }
 0x1ee   :  { %v773_v0 = vmul.f32 %v757_v33, %v741_v12 }
 0x1ef   :  { %v3185_v61 = vpop.xlane.xlu0 %625  ;;  %v3187_v18 = vpop.xlane.xlu1 %623  ;;  %1917 = vrot.lane.b32.xlu1 %v1916_v46, %s2124_s1 }
 0x1f0   :  { %v789_v35 = vmul.f32 %v773_v0, %v693_v48  ;;  %1611 = vrot.lane.b32.xlu0 %v1577_v60, %s2124_s1 }
 0x1f2   :  { %v1334_v9 = vmul.f32 0.0, %v789_v35 }
 0x1f3   :  { %v3191_v7 = vpop.xlane.xlu0 %629  ;;  %v3193_v63 = vpop.xlane.xlu1 %627 }
 0x1f4   :  { %3798 = vst [vmem:[#allocation46_spill] sm:$0xff] %v3193_v63  ;;  %1368 = vrot.lane.b32.xlu1 %v1334_v9, %s2124_s1 }
 0x1f7   :  { %v3196_v4 = vpop.xlane.xlu0 %633  ;;  %v3198_v38 = vpop.xlane.xlu1 %631 }
 0x1f8   :  { %3799 = vst [vmem:[#allocation42_spill] sm:$0xff] %v3196_v4 }
 0x1fb   :  { %v3200_v50 = vpop.xlane.xlu0 %637  ;;  %v3202_v43 = vpop.xlane.xlu1 %635 }
 0x1fc   :  { %3800 = vst [vmem:[#allocation43_spill] sm:$0xff] %v3200_v50  ;;  %3801 = vst [vmem:[#allocation50_spill] sm:$0xff] %v3202_v43 }
 0x1ff   :  { %v3204_v12 = vpop.xlane.xlu0 %641  ;;  %v3206_v46 = vpop.xlane.xlu1 %639 }
 0x200   :  { %3802 = vst [vmem:[#allocation52_spill] sm:$0xff] %v3204_v12  ;;  %3803 = vst [vmem:[#allocation48_spill] sm:$0xff] %v3206_v46 }
 0x203   :  { %v518_v33 = vpop.xlane.xlu0 %517  ;;  %v516_v60 = vpop.xlane.xlu1 %515 }
 0x204   :  { %2059 = vlog2.f32 %v518_v33 }
 0x205   :  { %2061 = vrcp.f32 %v518_v33 }
 0x206   :  { %2063 = vlog2.f32 %v516_v60 }
 0x207   :  { %2065 = vrcp.f32 %v516_v60  ;;  %v614_v35 = vpop.xlane.xlu0 %613  ;;  %v612_v50 = vpop.xlane.xlu1 %611 }
 0x208   :  { %2067 = vrcp.f32 %v3129_v36 }
 0x209   :  { %2069 = vrcp.f32 %v3125_v19 }
 0x20a   :  { %2071 = vlog2.f32 %v3129_v36  ;;  %v1042_v36 = vcvt.f32.s32 %v3105_v30 }
 0x20b   :  { %2073 = vlog2.f32 %v3125_v19 }
 0x20c   :  { %2075 = vrcp.f32 %v3137_v1 }
 0x20d   :  { %2077 = vrcp.f32 %v3131_v27 }
 0x20e   :  { %v2060_v48 = vpop.eup %2059  ;;  %2079 = vlog2.f32 %v3137_v1 }
 0x20f   :  { %v2062_v0 = vpop.eup %2061  ;;  %v646_v15 = vmul.f32 0.6931472, %v2060_v48  ;;  %2081 = vlog2.f32 %v3131_v27 }
 0x210   :  { %v2064_v9 = vpop.eup %2063  ;;  %v710_v4 = vmul.f32 %v2062_v0, %v614_v35  ;;  %2083 = vlog2.f32 %v3135_v54 }
 0x211   :  { %v2066_v42 = vpop.eup %2065  ;;  %v644_v47 = vmul.f32 0.6931472, %v2064_v9  ;;  %v676_v3 = vadd.f32 %v646_v15, %v2886_v56  ;;  %v874_v15 = vcvt.f32.s32 %v3044_v31  ;;  %2085 = vrcp.f32 %v3135_v54 }
 0x212   :  { %v740_v43 = vsub.f32 1.0, %v710_v4  ;;  %v708_v45 = vmul.f32 %v2066_v42, %v612_v50  ;;  %v958_v4 = vcvt.f32.s32 %v3076_v49  ;;  %v972_v49 = vcvt.f32.s32 %v3083_v16  ;;  %v3807_v16 = vld [vmem:[#allocation8_spill] sm:$0xff] }
 0x213   :  { %v675_v12 = vadd.f32 %v644_v47, %v2903_v26  ;;  %v692_v34 = vsub.f32 %v676_v3, %v2944_v29  ;;  %v3216_v26 = vpop.xlane.xlu0 %1293  ;;  %v902_v29 = vcvt.f32.s32 %v3055_v55  ;;  %v944_v3 = vcvt.f32.s32 %v3073_v10 }
 0x214   :  { %v756_v46 = vmul.f32 0.25, %v740_v43  ;;  %v739_v51 = vsub.f32 1.0, %v708_v45  ;;  %v930_v45 = vcvt.f32.s32 %v3066_v40  ;;  %v959_v10 = vshll.u32 %v958_v4, 16 }
 0x215   :  { %v691_v60 = vsub.f32 %v675_v12, %v3002_v44  ;;  %v875_v44 = vshll.u32 %v874_v15, 16  ;;  %v903_v12 = vshll.u32 %v902_v29, 16  ;;  %v3805_v15 = vld [vmem:[#allocation7_spill] sm:$0xff]  ;;  %2087 = vrcp.f32 %v3141_v57 }
 0x216   :  { %v755_v33 = vmul.f32 0.25, %v739_v51  ;;  %v772_v63 = vmul.f32 %v756_v46, %v740_v43  ;;  %2089 = vlog2.f32 %v3141_v57  ;;  %v3819_v57 = vld [vmem:[#allocation31_spill] sm:$0xff] }
 0x217   :  { %2091 = vrcp.f32 %v3143_v2 }
 0x218   :  { %v771_v39 = vmul.f32 %v755_v33, %v739_v51  ;;  %v788_v35 = vmul.f32 %v772_v63, %v692_v34  ;;  %v888_v51 = vcvt.f32.s32 %v3053_v8  ;;  %v1319_v34 = vsub.f32 0.0, %v3031_v37  ;;  %v3804_v37 = vld [vmem:[#allocation5_spill] sm:$0xff] }
 0x219   :  { %v916_v63 = vcvt.f32.s32 %v3063_v28  ;;  %v931_v33 = vshll.u32 %v930_v45, 16  ;;  %2093 = vrcp.f32 %v3148_v20 }
 0x21a   :  { %v787_v0 = vmul.f32 %v771_v39, %v691_v60  ;;  %v1333_v42 = vmul.f32 %v3168_v58, %v788_v35  ;;  %v889_v43 = vshll.u32 %v888_v51, 16  ;;  %v3226_v8 = vmul.f32 0.0, %v1319_v34 }
 0x21b   :  { %v917_v55 = vshll.u32 %v916_v63, 16  ;;  %v945_v60 = vshll.u32 %v944_v3, 16  ;;  %2095 = vlog2.f32 %v3148_v20 }
 0x21c   :  { %v1332_v9 = vmul.f32 %v3162_v21, %v787_v0  ;;  %v986_v0 = vcvt.f32.s32 %v3086_v6  ;;  %2097 = vlog2.f32 %v3143_v2 }
 0x21e   :  { %1364 = vrot.lane.b32.xlu0 %v1332_v9, %s2124_s1  ;;  %v1000_v9 = vcvt.f32.s32 %v3093_v25  ;;  %v973_v25 = vshll.u32 %v972_v49, 16  ;;  %v987_v45 = vshll.u32 %v986_v0, 16  ;;  %v1056_v49 = vcvt.f32.s32 %v3113_v32 }
 0x220   :  { %v1001_v4 = vshll.u32 %v1000_v9, 16  ;;  %v3810_v9 = vld [vmem:[#allocation11_spill] sm:$0xff] }
 0x222   :  { %1366 = vrot.lane.b32.xlu0 %v1333_v42, %s2124_s1  ;;  %v1014_v42 = vcvt.f32.s32 %v3096_v41  ;;  %v1028_v41 = vcvt.f32.s32 %v3103_v24 }
 0x237   :  { %v872_v56 = vpop.xlane.xlu0 %871 }
 0x238   :  { %v873_v47 = vcvt.f32.s32 %v872_v56 }
 0x23a   :  { %v876_v39 = vadd.s32 %v875_v44, %v873_v47  ;;  %v3806_v44 = vmov 0.0  }
 0x23b   :  { %v900_v50 = vpop.xlane.xlu0 %899  ;;  %v886_v31 = vpop.xlane.xlu1 %885 }
 0x23c   :  { %v901_v46 = vcvt.f32.s32 %v900_v50  ;;  %v887_v48 = vcvt.f32.s32 %v886_v31  ;;  %vm1061_vm14 = vcmp.eq.s32.totalorder %v876_v39, %v3804_v37  ;;  %v1015_v50 = vshll.u32 %v1014_v42, 16  ;;  %v3808_v31 = vld [vmem:[#allocation9_spill] sm:$0xff] }
 0x23d   :  { %v1816_v51 = vsel %vm1061_vm14, 1.0, %v3806_v44  ;;  %vm1412_vm14 = vcmask 7168  }
 0x23e   :  { %v904_v28 = vadd.s32 %v903_v12, %v901_v46  ;;  %v890_v40 = vadd.s32 %v889_v43, %v887_v48 }
 0x23f   :  { %v914_v35 = vpop.xlane.xlu1 %913 }
 0x240   :  { %vm1062_vm15 = vcmp.eq.s32.totalorder %v890_v40, %v3805_v15  ;;  %v915_v56 = vcvt.f32.s32 %v914_v35  ;;  %vm1063_vm4 = vcmp.eq.s32.totalorder %v904_v28, %v3807_v16  ;;  %v1029_v40 = vshll.u32 %v1028_v41, 16  ;;  %v2068_v35 = vpop.eup %2067 }
 0x241   :  { %v928_v47 = vpop.xlane.xlu0 %927  ;;  %v1817_v29 = vsel %vm1062_vm15, 1.0, %v3806_v44  ;;  %v1818_v46 = vsel %vm1063_vm4, 1.0, %v3806_v44  ;;  %v860_v28 = vcvt.f32.s32 %v3117_v22  ;;  %v3811_v22 = vld [vmem:[#allocation12_spill] sm:$0xff]  ;;  %v846_v16 = vcvt.f32.s32 %v3119_v62 }
 0x242   :  { %v929_v34 = vcvt.f32.s32 %v928_v47  ;;  %v1921_v6 = vpack.i.bf16 %v1817_v29, %v1816_v51  ;;  %v918_v63 = vadd.s32 %v917_v55, %v915_v56  ;;  %v2070_v51 = vpop.eup %2069  ;;  %v1043_v29 = vshll.u32 %v1042_v36, 16  ;;  %v3813_v36 = vld [vmem:[#allocation14_spill] sm:$0xff] }
 0x243   :  { %v942_v3 = vpop.xlane.xlu1 %941  ;;  %v3264_v41 = vshll.u32 %v860_v28, 16 }
 0x244   :  { %v932_v39 = vadd.s32 %v931_v33, %v929_v34  ;;  %vm1064_vm10 = vcmp.eq.s32.totalorder %v918_v63, %v3808_v31  ;;  %v943_v43 = vcvt.f32.s32 %v942_v3  ;;  %1922 = vrot.lane.b32.xlu0 %v1921_v6, %s2125_s24  ;;  %v3809_v33 = vld [vmem:[#allocation10_spill] sm:$0xff]  ;;  %v1057_v34 = vshll.u32 %v1056_v49, 16  ;;  %v3812_v3 = vld [vmem:[#allocation13_spill] sm:$0xff]  ;;  %v3814_v49 = vld [vmem:[#allocation15_spill] sm:$0xff] }
 0x245   :  { %v956_v12 = vpop.xlane.xlu0 %955  ;;  %v1819_v48 = vsel %vm1064_vm10, 1.0, %v3806_v44  ;;  %vm1801_vm10 = vcmask 1040384  }
 0x246   :  { %v957_v24 = vcvt.f32.s32 %v956_v12  ;;  %v1926_v55 = vpack.i.bf16 %v1819_v48, %v1818_v46  ;;  %vm1065_vm8 = vcmp.eq.s32.totalorder %v932_v39, %v3809_v33  ;;  %v946_v37 = vadd.s32 %v945_v60, %v943_v43 }
 0x247   :  { %v970_v30 = vpop.xlane.xlu1 %969  ;;  %v3257_v60 = vmul.f32 %v2068_v35, %v3176_v14  ;;  %v1820_v32 = vsel %vm1065_vm8, 1.0, %v3806_v44  ;;  %v2072_v14 = vpop.eup %2071  ;;  %v714_v39 = vmul.f32 %v2070_v51, %v3170_v52  ;;  %v847_v46 = vshll.u32 %v846_v16, 16  ;;  %v3817_v16 = vld [vmem:[#allocation17_spill] sm:$0xff] }
 0x248   :  { %v960_v0 = vadd.s32 %v959_v10, %v957_v24  ;;  %vm1066_vm2 = vcmp.eq.s32.totalorder %v946_v37, %v3810_v9  ;;  %v971_v42 = vcvt.f32.s32 %v970_v30  ;;  %1927 = vrot.lane.b32.xlu1 %v1926_v55, %s2125_s24  ;;  %v654_v48 = vmul.f32 0.6931472, %v2072_v14  ;;  %v2074_v33 = vpop.eup %2073 }
 0x249   :  { %v984_v19 = vpop.xlane.xlu0 %983  ;;  %v1821_v15 = vsel %vm1066_vm2, 1.0, %v3806_v44  ;;  %v742_v37 = vsub.f32 1.0, %v714_v39  ;;  %v2076_v27 = vpop.eup %2075  ;;  %vm1803_vm8 = vcmask 1041408   ;;  %vm1805_vm2 = vcmask 1042432  }
 0x24a   :  { %v985_v10 = vcvt.f32.s32 %v984_v19  ;;  %v1931_v56 = vpack.i.bf16 %v1821_v15, %v1820_v32  ;;  %vm1067_vm3 = vcmp.eq.s32.totalorder %v960_v0, %v3811_v22  ;;  %v974_v47 = vadd.s32 %v973_v25, %v971_v42  ;;  %v2078_v9 = vpop.eup %2077  ;;  %v3815_v19 = vld [vmem:[#allocation16_spill] sm:$0xff] }
 0x24b   :  { %v998_v63 = vpop.xlane.xlu1 %997  ;;  %v744_v25 = vsub.f32 1.0, %v3257_v60  ;;  %v1822_v43 = vsel %vm1067_vm3, 1.0, %v3806_v44  ;;  %v3285_v42 = vmul.f32 %v2076_v27, %v3187_v18  ;;  %v650_v32 = vmul.f32 0.6931472, %v2074_v33  ;;  %v3816_v15 = vld [vmem:[#allocation32_spill] sm:$0xff] }
 0x24c   :  { %v988_v6 = vadd.s32 %v987_v45, %v985_v10  ;;  %vm1068_vm5 = vcmp.eq.s32.totalorder %v974_v47, %v3812_v3  ;;  %v999_v31 = vcvt.f32.s32 %v998_v63  ;;  %1932 = vrot.lane.b32.xlu0 %v1931_v56, %s2125_s24  ;;  %v680_v10 = vadd.f32 %v654_v48, %v3816_v15  ;;  %v2080_v47 = vpop.eup %2079  ;;  %v3818_v3 = vld [vmem:[#allocation18_spill] sm:$0xff] }
 0x24d   :  { %v1012_v1 = vpop.xlane.xlu0 %1011  ;;  %v1823_v62 = vsel %vm1068_vm5, 1.0, %v3806_v44  ;;  %v760_v35 = vmul.f32 0.25, %v744_v25  ;;  %v758_v51 = vmul.f32 0.25, %v742_v37  ;;  %v716_v63 = vmul.f32 %v2078_v9, %v3179_v17  ;;  %v2082_v17 = vpop.eup %2081  ;;  %v3821_v9 = vld [vmem:[#allocation33_spill] sm:$0xff] }
 0x24e   :  { %v1013_v45 = vcvt.f32.s32 %v1012_v1  ;;  %v1936_v12 = vpack.i.bf16 %v1823_v62, %v1822_v43  ;;  %vm1069_vm7 = vcmp.eq.s32.totalorder %v988_v6, %v3813_v36  ;;  %v1002_v52 = vadd.s32 %v1001_v4, %v999_v31  ;;  %v3820_v36 = vld [vmem:[#allocation19_spill] sm:$0xff] }
 0x24f   :  { %v1026_v55 = vpop.xlane.xlu1 %1025  ;;  %v1824_v4 = vsel %vm1069_vm7, 1.0, %v3806_v44  ;;  %v776_v18 = vmul.f32 %v760_v35, %v744_v25  ;;  %v745_v39 = vsub.f32 1.0, %v3285_v42  ;;  %v678_v1 = vadd.f32 %v650_v32, %v3819_v57 }
 0x250   :  { %v1016_v24 = vadd.s32 %v1015_v50, %v1013_v45  ;;  %vm1070_vm13 = vcmp.eq.s32.totalorder %v1002_v52, %v3814_v49  ;;  %v1027_v0 = vcvt.f32.s32 %v1026_v55  ;;  %1937 = vrot.lane.b32.xlu1 %v1936_v12, %s2125_s24  ;;  %v656_v43 = vmul.f32 0.6931472, %v2080_v47 }
 0x251   :  { %v1040_v30 = vpop.xlane.xlu0 %1039  ;;  %v1825_v28 = vsel %vm1070_vm13, 1.0, %v3806_v44  ;;  %v696_v62 = vsub.f32 %v680_v10, %v2960_v23  ;;  %v774_v12 = vmul.f32 %v758_v51, %v742_v37  ;;  %v694_v35 = vsub.f32 %v678_v1, %v2946_v5 }
 0x252   :  { %v1041_v50 = vcvt.f32.s32 %v1040_v30  ;;  %v1941_v54 = vpack.i.bf16 %v1825_v28, %v1824_v4  ;;  %vm1071_vm6 = vcmp.eq.s32.totalorder %v1016_v24, %v3815_v19  ;;  %v1030_v60 = vadd.s32 %v1029_v40, %v1027_v0  ;;  %v2084_v24 = vpop.eup %2083  ;;  %v3823_v19 = vld [vmem:[#allocation6_spill] sm:$0xff] }
 0x253   :  { %v1054_v22 = vpop.xlane.xlu1 %1053  ;;  %v1826_v40 = vsel %vm1071_vm6, 1.0, %v3806_v44  ;;  %v792_v55 = vmul.f32 %v776_v18, %v696_v62  ;;  %v2086_v23 = vpop.eup %2085  ;;  %v761_v0 = vmul.f32 0.25, %v745_v39  ;;  %v681_v42 = vadd.f32 %v656_v43, %v3821_v9 }
 0x254   :  { %v1044_v56 = vadd.s32 %v1043_v29, %v1041_v50  ;;  %vm1072_vm0 = vcmp.eq.s32.totalorder %v1030_v60, %v3817_v16  ;;  %v1055_v6 = vcvt.f32.s32 %v1054_v22  ;;  %1942 = vrot.lane.b32.xlu0 %v1941_v54, %s2125_s24  ;;  %v652_v50 = vmul.f32 0.6931472, %v2082_v17  ;;  %v3822_v54 = vld [vmem:[#allocation4_spill] sm:$0xff]  ;;  %v3824_v16 = vld [vmem:[#allocation30_spill] sm:$0xff] }
 0x255   :  { %v1827_v14 = vsel %vm1072_vm0, 1.0, %v3806_v44  ;;  %v1337_v10 = vmul.f32 0.0, %v792_v55  ;;  %v697_v18 = vsub.f32 %v681_v42, %v3021_v13  ;;  %v658_v17 = vmul.f32 0.6931472, %v2084_v24  ;;  %v3826_v55 = vld [vmem:[#allocation70_spill] sm:$0xff]  ;;  %v3830_v42 = vld [vmem:[#allocation61_spill] sm:$0xff] }
 0x256   :  { %v1946_v29 = vpack.i.bf16 %v1827_v14, %v1826_v40  ;;  %vm1073_vm1 = vcmp.eq.s32.totalorder %v1044_v56, %v3818_v3  ;;  %v1058_v31 = vadd.s32 %v1057_v34, %v1055_v6  ;;  %v743_v34 = vsub.f32 1.0, %v716_v63 }
 0x257   :  { %v844_v25 = vpop.xlane.xlu0 %843  ;;  %v858_v45 = vpop.xlane.xlu1 %857  ;;  %v1828_v33 = vsel %vm1073_vm1, 1.0, %v3806_v44  ;;  %v777_v56 = vmul.f32 %v761_v0, %v745_v39  ;;  %v679_v6 = vadd.f32 %v652_v50, %v3824_v16  ;;  %v722_v40 = vmul.f32 %v2086_v23, %v3185_v61 }
 0x258   :  { %vm1074_vm9 = vcmp.eq.s32.totalorder %v1058_v31, %v3820_v36  ;;  %v845_v52 = vcvt.f32.s32 %v844_v25  ;;  %v859_v48 = vcvt.f32.s32 %v858_v45  ;;  %1947 = vrot.lane.b32.xlu0 %v1946_v29, %s2125_s24  ;;  %v759_v60 = vmul.f32 0.25, %v743_v34 }
 0x259   :  { %v1829_v49 = vsel %vm1074_vm9, 1.0, %v3806_v44  ;;  %v793_v39 = vmul.f32 %v777_v56, %v697_v18  ;;  %v695_v13 = vsub.f32 %v679_v6, %v3016_v53  ;;  %v1322_v61 = vsub.f32 0.0, %v3039_v59  ;;  %v3825_v53 = vld [vmem:[#allocation39_spill] sm:$0xff] }
 0x25a   :  { %v1951_v30 = vpack.i.bf16 %v1829_v49, %v1828_v33  ;;  %v848_v27 = vadd.s32 %v847_v46, %v845_v52  ;;  %v862_v37 = vadd.s32 %v3264_v41, %v859_v48  ;;  %v2088_v41 = vpop.eup %2087  ;;  %v790_v46 = vmul.f32 %v774_v12, %v694_v35  ;;  %v3827_v33 = vld [vmem:[#allocation46_spill] sm:$0xff] }
 0x25b   :  { %v3310_v4 = vpop.xlane.xlu0 %1302  ;;  %v3312_v28 = vpop.xlane.xlu1 %1296  ;;  %v726_v22 = vmul.f32 %v2088_v41, %v3191_v7  ;;  %v775_v7 = vmul.f32 %v759_v60, %v743_v34  ;;  %v746_v1 = vsub.f32 1.0, %v722_v40  ;;  %v1338_v62 = vmul.f32 0.0, %v793_v39  ;;  %v3831_v60 = vld [vmem:[#allocation68_spill] sm:$0xff] }
 0x25c   :  { %vm1059_vm11 = vcmp.eq.s32.totalorder %v848_v27, %v3822_v54  ;;  %vm1060_vm12 = vcmp.eq.s32.totalorder %v862_v37, %v3823_v19  ;;  %1613 = vrot.lane.b32.xlu0 %v3226_v8, %s2124_s1  ;;  %1952 = vrot.lane.b32.xlu1 %v1951_v30, %s2125_s24  ;;  %v2090_v15 = vpop.eup %2089  ;;  %v1335_v14 = vmul.f32 0.0, %v790_v46  ;;  %v1320_v45 = vsub.f32 0.0, %v3042_v11  ;;  %v3828_v30 = vld [vmem:[#allocation34_spill] sm:$0xff] }
 0x25d   :  { %v1814_v5 = vsel %vm1059_vm11, 1.0, %v3806_v44  ;;  %v1815_v32 = vsel %vm1060_vm12, 1.0, %v3806_v44  ;;  %v2092_v63 = vpop.eup %2091  ;;  %v748_v29 = vsub.f32 1.0, %v726_v22  ;;  %v662_v31 = vmul.f32 0.6931472, %v2090_v15  ;;  %v3829_v37 = vld [vmem:[#allocation38_spill] sm:$0xff] }
 0x25e   :  { %v1956_v47 = vpack.i.bf16 %v1815_v32, %v1814_v5  ;;  %v2094_v57 = vpop.eup %2093  ;;  %v791_v43 = vmul.f32 %v775_v7, %v695_v13  ;;  %v1581_v48 = vmul.f32 0.0, %v1322_v61  ;;  %v1323_v34 = vsub.f32 0.0, %v3826_v55  ;;  %v3834_v61 = vld [vmem:[#allocation35_spill] sm:$0xff] }
 0x25f   :  { %v3324_v51 = vpop.xlane.xlu0 %1305  ;;  %v3326_v8 = vpop.xlane.xlu1 %1299  ;;  %v764_v25 = vmul.f32 0.25, %v748_v29  ;;  %v728_v2 = vmul.f32 %v2094_v57, %v3198_v38  ;;  %v684_v52 = vadd.f32 %v662_v31, %v3825_v53  ;;  %v724_v49 = vmul.f32 %v2092_v63, %v3827_v33  ;;  %v3832_v63 = vld [vmem:[#allocation41_spill] sm:$0xff] }
 0x260   :  { %1374 = vrot.lane.b32.xlu0 %v1337_v10, %s2124_s1  ;;  %1957 = vrot.lane.b32.xlu1 %v1956_v47, %s2125_s24  ;;  %v2096_v59 = vpop.eup %2095  ;;  %v1336_v38 = vmul.f32 0.0, %v791_v43  ;;  %v762_v11 = vmul.f32 0.25, %v746_v1  ;;  %v1579_v0 = vmul.f32 0.0, %v1320_v45  ;;  %v682_v27 = vadd.f32 %v658_v17, %v3828_v30  ;;  %v3835_v43 = vld [vmem:[#allocation66_spill] sm:$0xff]  ;;  %v3838_v30 = vld [vmem:[#allocation45_spill] sm:$0xff] }
 0x261   :  { %v780_v24 = vmul.f32 %v764_v25, %v748_v29  ;;  %v749_v23 = vsub.f32 1.0, %v728_v2  ;;  %2099 = vrcp.f32 %v3829_v37  ;;  %v664_v9 = vmul.f32 0.6931472, %v2096_v59  ;;  %v2098_v46 = vpop.eup %2097  ;;  %v3836_v17 = vld [vmem:[#allocation42_spill] sm:$0xff] }
 0x262   :  { %v700_v54 = vsub.f32 %v684_v52, %v3830_v42  ;;  %v1321_v5 = vsub.f32 0.0, %v3831_v60  ;;  %v1582_v32 = vmul.f32 0.0, %v1323_v34  ;;  %v747_v15 = vsub.f32 1.0, %v724_v49  ;;  %v3837_v52 = vld [vmem:[#allocation65_spill] sm:$0xff] }
 0x263   :  { %v3334_v20 = vpop.xlane.xlu0 %1314  ;;  %v3336_v3 = vpop.xlane.xlu1 %1308  ;;  %v778_v56 = vmul.f32 %v762_v11, %v746_v1  ;;  %v765_v47 = vmul.f32 0.25, %v749_v23  ;;  %2101 = vlog2.f32 %v3829_v37  ;;  %v660_v18 = vmul.f32 0.6931472, %v2098_v46 }
 0x264   :  { %1967 = vrot.lane.b32.xlu0 %v3806_v44, %s2124_s1  ;;  %1370 = vrot.lane.b32.xlu1 %v1335_v14, %s2124_s1  ;;  %v796_v22 = vmul.f32 %v780_v24, %v700_v54  ;;  %v685_v40 = vadd.f32 %v664_v9, %v3832_v63  ;;  %v3833_v14 = vld [vmem:[#allocation60_spill] sm:$0xff]  ;;  %v1580_v39 = vmul.f32 0.0, %v1321_v5  ;;  %v763_v13 = vmul.f32 0.25, %v747_v15 }
 0x265   :  { %v698_v7 = vsub.f32 %v682_v27, %v3833_v14  ;;  %v781_v57 = vmul.f32 %v765_v47, %v749_v23  ;;  %v683_v1 = vadd.f32 %v660_v18, %v3834_v61  ;;  %v1326_v49 = vsub.f32 0.0, %v3326_v8 }
 0x266   :  { %v1341_v31 = vmul.f32 0.0, %v796_v22  ;;  %v779_v45 = vmul.f32 %v763_v13, %v747_v15  ;;  %v1324_v23 = vsub.f32 0.0, %v3216_v26  ;;  %v1325_v8 = vsub.f32 0.0, %v3312_v28 }
 0x267   :  { %v1610_v12 = vpop.permute.xlu0 %1609  ;;  %v3345_v36 = vpop.xlane.xlu1 %1311  ;;  %v794_v29 = vmul.f32 %v778_v56, %v698_v7  ;;  %v699_v59 = vsub.f32 %v683_v1, %v3837_v52 }
 0x268   :  { %1376 = vrot.lane.b32.xlu0 %v1338_v62, %s2124_s1  ;;  %1962 = vrot.lane.b32.xlu1 %v3806_v44, %s2124_s1  ;;  %v1656_v19 = vsel %vm1412_vm14, %v1610_v12, 0.0  ;;  %v701_v62 = vsub.f32 %v685_v40, %v3835_v43  ;;  %v1584_v54 = vmul.f32 0.0, %v1325_v8 }
 0x269   :  { %v1339_v2 = vmul.f32 0.0, %v794_v29  ;;  %v795_v55 = vmul.f32 %v779_v45, %v699_v59 }
 0x26a   :  { %v797_v53 = vmul.f32 %v781_v57, %v701_v62 }
 0x26b   :  { %v1612_v35 = vpop.permute.xlu0 %1611  ;;  %v1608_v50 = vpop.permute.xlu1 %1607  ;;  %v1340_v11 = vmul.f32 0.0, %v795_v55 }
 0x26c   :  { %v1655_v41 = vsel %vm1412_vm14, %v1608_v50, 0.0  ;;  %1619 = vrot.lane.b32.xlu0 %v1581_v48, %s2124_s1  ;;  %1372 = vrot.lane.b32.xlu1 %v1336_v38, %s2124_s1  ;;  %v1658_v16 = vsel %vm1412_vm14, %v1612_v35, 0.0  ;;  %v2100_v25 = vpop.eup %2099  ;;  %v1342_v33 = vmul.f32 0.0, %v797_v53  ;;  %v1583_v35 = vmul.f32 0.0, %v1324_v23  ;;  %v3839_v50 = vld [vmem:[#allocation62_spill] sm:$0xff] }
 0x26d   :  { %v1657_v10 = vadd.f32 %v1656_v19, %v1655_v41  ;;  %v730_v12 = vmul.f32 %v2100_v25, %v3836_v17  ;;  %v2102_v48 = vpop.eup %2101 }
 0x26e   :  { %v666_v38 = vmul.f32 0.6931472, %v2102_v48 }
 0x26f   :  { %v3363_v6 = vadd.f32 %v1658_v16, %v1657_v10  ;;  %v750_v34 = vsub.f32 1.0, %v730_v12  ;;  %v3397_v5 = vpop.permute.xlu1 %1917 }
 0x270   :  { %1621 = vrot.lane.b32.xlu0 %v1582_v32, %s2124_s1  ;;  %1615 = vrot.lane.b32.xlu1 %v1579_v0, %s2124_s1  ;;  %v1585_v0 = vmul.f32 0.0, %v1326_v49  ;;  %v686_v27 = vadd.f32 %v666_v38, %v3838_v30  ;;  %v3840_v32 = vld [vmem:[#allocation36_spill] sm:$0xff] }
 0x271   :  { %v766_v24 = vmul.f32 0.25, %v750_v34  ;;  %2103 = vrcp.f32 %v3840_v32 }
 0x272   :  { %v702_v9 = vsub.f32 %v686_v27, %v3839_v50  ;;  %2105 = vlog2.f32 %v3840_v32 }
 0x273   :  { %v782_v37 = vmul.f32 %v766_v24, %v750_v34  ;;  %v3401_v15 = vpop.permute.xlu1 %1368  ;;  %v3842_v34 = vld [vmem:[#allocation37_spill] sm:$0xff] }
 0x274   :  { %1382 = vrot.lane.b32.xlu0 %v1341_v31, %s2124_s1  ;;  %1617 = vrot.lane.b32.xlu1 %v1580_v39, %s2124_s1  ;;  %v3841_v39 = vld [vmem:[#allocation50_spill] sm:$0xff]  ;;  %2107 = vrcp.f32 %v3842_v34 }
 0x275   :  { %v798_v42 = vmul.f32 %v782_v37, %v702_v9 }
 0x277   :  { %v1343_v26 = vmul.f32 0.0, %v798_v42 }
 0x278   :  { %1977 = vrot.lane.b32.xlu0 %v3806_v44, %s2124_s1  ;;  %1378 = vrot.lane.b32.xlu1 %v1339_v2, %s2124_s1 }
 0x27b   :  { %v2104_v63 = vpop.eup %2103 }
 0x27c   :  { %1384 = vrot.lane.b32.xlu0 %v1342_v33, %s2124_s1  ;;  %1972 = vrot.lane.b32.xlu1 %v3806_v44, %s2124_s1  ;;  %v732_v29 = vmul.f32 %v2104_v63, %v3841_v39  ;;  %v2106_v43 = vpop.eup %2105 }
 0x27d   :  { %v668_v48 = vmul.f32 0.6931472, %v2106_v43 }
 0x27e   :  { %v751_v45 = vsub.f32 1.0, %v732_v29  ;;  %v2108_v63 = vpop.eup %2107 }
 0x280   :  { %1380 = vrot.lane.b32.xlu1 %v1340_v11, %s2124_s1  ;;  %1627 = vrot.lane.b32.xlu0 %v1585_v0, %s2124_s1  ;;  %v3843_v11 = vld [vmem:[#allocation40_spill] sm:$0xff]  ;;  %v767_v24 = vmul.f32 0.25, %v751_v45 }
 0x281   :  { %2109 = vrcp.f32 %v3843_v11 }
 0x282   :  { %2111 = vlog2.f32 %v3842_v34 }
 0x283   :  { %2113 = vlog2.f32 %v3843_v11 }
 0x284   :  { %1623 = vrot.lane.b32.xlu1 %v1583_v35, %s2124_s1  ;;  %v3844_v35 = vld [vmem:[#allocation47_spill] sm:$0xff] }
 0x285   :  { %v687_v8 = vadd.f32 %v668_v48, %v3844_v35  ;;  %v1919_v35 = vunpack.i.l.bf16 %v3397_v5 }
 0x288   :  { %1625 = vrot.lane.b32.xlu1 %v1584_v54, %s2124_s1 }
 0x28b   :  { %v2110_v29 = vpop.eup %2109 }
 0x28c   :  { %1386 = vrot.lane.b32.xlu1 %v1343_v26, %s2124_s1  ;;  %v783_v26 = vmul.f32 %v767_v24, %v751_v45  ;;  %v2112_v43 = vpop.eup %2111 }
 0x28d   :  { %v674_v24 = vmul.f32 0.6931472, %v2112_v43 }
 0x290   :  { %v1365_v19 = vpop.permute.xlu0 %1364  ;;  %1982 = vrot.lane.b32.xlu1 %v3806_v44, %s2124_s1 }
 0x291   :  { %v1413_v46 = vsel %vm1412_vm14, %v1365_v19, 0.0 }
 0x294   :  { %v1367_v41 = vpop.permute.xlu0 %1366 }
 0x295   :  { %v1414_v28 = vsel %vm1412_vm14, %v1367_v41, 0.0 }
 0x296   :  { %v3395_v60 = vadd.f32 %v1414_v28, %v1413_v46 }
 0x2b6   :  { %v1923_v10 = vpop.permute.xlu0 %1922 }
 0x2b7   :  { %v1925_v56 = vunpack.i.h.bf16 %v1923_v10  ;;  %v1924_v22 = vunpack.i.l.bf16 %v1923_v10  ;;  %v3845_v10 = vld [vmem:[#allocation67_spill] sm:$0xff] }
 0x2b9   :  { %v1174_v47 = vsub.f32 0.0, %v1925_v56  ;;  %v1173_v16 = vsub.f32 0.0, %v1924_v22  ;;  %v703_v56 = vsub.f32 %v687_v8, %v3845_v10  ;;  %v3856_v10 = vld [vmem:[#allocation48_spill] sm:$0xff] }
 0x2ba   :  { %v1928_v18 = vpop.permute.xlu1 %1927 }
 0x2bb   :  { %v1189_v40 = vmul.f32 %v1173_v16, %v1173_v16  ;;  %v1930_v14 = vunpack.i.h.bf16 %v1928_v18  ;;  %v1929_v7 = vunpack.i.l.bf16 %v1928_v18  ;;  %v1190_v31 = vmul.f32 %v1174_v47, %v1174_v47  ;;  %v3846_v16 = vld [vmem:[#allocation44_spill] sm:$0xff] }
 0x2bc   :  { %2115 = vrcp.f32 %v3846_v16  ;;  %v799_v18 = vmul.f32 %v783_v26, %v703_v56  ;;  %v1329_v26 = vsub.f32 0.0, %v3336_v3 }
 0x2bd   :  { %v1456_v13 = vmul.f32 0.0, %v1189_v40  ;;  %v1176_v57 = vsub.f32 0.0, %v1930_v14  ;;  %v1175_v61 = vsub.f32 0.0, %v1929_v7  ;;  %v1457_v17 = vmul.f32 0.0, %v1190_v31  ;;  %v3847_v31 = vld [vmem:[#allocation52_spill] sm:$0xff] }
 0x2be   :  { %v1933_v1 = vpop.permute.xlu0 %1932  ;;  %2117 = vlog2.f32 %v3846_v16 }
 0x2bf   :  { %v1192_v62 = vmul.f32 %v1176_v57, %v1176_v57  ;;  %v1935_v25 = vunpack.i.h.bf16 %v1933_v1  ;;  %v1934_v2 = vunpack.i.l.bf16 %v1933_v1  ;;  %1490 = vrot.lane.b32.xlu0 %v1456_v13, %s2124_s1  ;;  %v1191_v53 = vmul.f32 %v1175_v61, %v1175_v61 }
 0x2c0   :  { %v738_v13 = vmul.f32 %v2108_v63, %v3847_v31  ;;  %v1588_v31 = vmul.f32 0.0, %v1329_v26 }
 0x2c1   :  { %v1459_v12 = vmul.f32 0.0, %v1192_v62  ;;  %v1178_v52 = vsub.f32 0.0, %v1935_v25  ;;  %v1177_v59 = vsub.f32 0.0, %v1934_v2  ;;  %v1458_v0 = vmul.f32 0.0, %v1191_v53  ;;  %v3848_v62 = vld [vmem:[#allocation43_spill] sm:$0xff] }
 0x2c2   :  { %v1938_v55 = vpop.permute.xlu1 %1937  ;;  %v3428_v25 = vmul.f32 %v2110_v29, %v3848_v62  ;;  %v1328_v2 = vsub.f32 0.0, %v3324_v51  ;;  %v1327_v29 = vsub.f32 0.0, %v3310_v4 }
 0x2c3   :  { %v1193_v33 = vmul.f32 %v1177_v59, %v1177_v59  ;;  %v1940_v49 = vunpack.i.h.bf16 %v1938_v55  ;;  %v1939_v38 = vunpack.i.l.bf16 %v1938_v55  ;;  %1492 = vrot.lane.b32.xlu0 %v1457_v17, %s2124_s1  ;;  %1496 = vrot.lane.b32.xlu1 %v1459_v12, %s2124_s1  ;;  %v1194_v23 = vmul.f32 %v1178_v52, %v1178_v52  ;;  %v3849_v52 = vld [vmem:[#allocation20_spill] sm:$0xff]  ;;  %v3850_v59 = vld [vmem:[#allocation2_spill] sm:$0xff] }
 0x2c4   :  { %v1344_v17 = vmul.f32 0.0, %v799_v18  ;;  %vm3851_vm15 = vcmp.gt.f32.partialorder %v3850_v59, 0.5  ;;  %v754_v55 = vsub.f32 1.0, %v738_v13  ;;  %v1416_v13 = vsel %vm1412_vm14, %v3401_v15, 0.0  ;;  %v3857_v59 = vld [vmem:[#allocation51_spill] sm:$0xff] }
 0x2c5   :  { %v1460_v30 = vmul.f32 0.0, %v1193_v33  ;;  %v1180_v27 = vsub.f32 0.0, %v1940_v49  ;;  %v1179_v37 = vsub.f32 0.0, %v1939_v38  ;;  %v1461_v19 = vmul.f32 0.0, %v1194_v23  ;;  %v3852_v49 = vld [vmem:[#allocation21_spill] sm:$0xff]  ;;  %v3853_v38 = vld [vmem:[#allocation3_spill] sm:$0xff] }
 0x2c6   :  { %v1943_v50 = vpop.permute.xlu0 %1942  ;;  %v353_v48 = vsel %vm3851_vm15, %v3849_v52, 0.0  ;;  %vm3854_vm4 = vcmp.gt.f32.partialorder %v3853_v38, 0.5 }
 0x2c7   :  { %v1196_v9 = vmul.f32 %v1180_v27, %v1180_v27  ;;  %v1945_v42 = vunpack.i.h.bf16 %v1943_v50  ;;  %v1944_v54 = vunpack.i.l.bf16 %v1943_v50  ;;  %1498 = vrot.lane.b32.xlu1 %v1460_v30, %s2124_s1  ;;  %1494 = vrot.lane.b32.xlu0 %v1458_v0, %s2124_s1  ;;  %v1195_v46 = vmul.f32 %v1179_v37, %v1179_v37 }
 0x2c8   :  { %v354_v11 = vsel %vm3854_vm4, %v3852_v49, 0.0  ;;  %v752_v0 = vsub.f32 1.0, %v3428_v25  ;;  %v1587_v30 = vmul.f32 0.0, %v1328_v2  ;;  %v1920_v27 = vunpack.i.h.bf16 %v3397_v5 }
 0x2c9   :  { %v1463_v41 = vmul.f32 0.0, %v1196_v9  ;;  %v1182_v28 = vsub.f32 0.0, %v1945_v42  ;;  %v1181_v32 = vsub.f32 0.0, %v1944_v54  ;;  %v1462_v40 = vmul.f32 0.0, %v1195_v46 }
 0x2ca   :  { %v3415_v22 = vpop.permute.xlu0 %1947  ;;  %v770_v54 = vmul.f32 0.25, %v754_v55  ;;  %v768_v5 = vmul.f32 0.25, %v752_v0  ;;  %v1761_v18 = vsel %vm1412_vm14, %v1920_v27, 0.0 }
 0x2cb   :  { %v1197_v47 = vmul.f32 %v1181_v32, %v1181_v32  ;;  %1504 = vrot.lane.b32.xlu1 %v1463_v41, %s2124_s1  ;;  %1500 = vrot.lane.b32.xlu0 %v1461_v19, %s2124_s1  ;;  %v1198_v14 = vmul.f32 %v1182_v28, %v1182_v28  ;;  %v1950_v39 = vunpack.i.h.bf16 %v3415_v22  ;;  %v3855_v28 = vld [vmem:[#allocation56_spill] sm:$0xff]  ;;  %v1949_v63 = vunpack.i.l.bf16 %v3415_v22 }
 0x2cc   :  { %v690_v32 = vadd.f32 %v674_v24, %v3855_v28  ;;  %v784_v24 = vmul.f32 %v768_v5, %v752_v0 }
 0x2cd   :  { %v1464_v7 = vmul.f32 0.0, %v1197_v47  ;;  %v1465_v12 = vmul.f32 0.0, %v1198_v14  ;;  %v1184_v53 = vsub.f32 0.0, %v1950_v39  ;;  %v786_v39 = vmul.f32 %v770_v54, %v754_v55  ;;  %v3858_v55 = vld [vmem:[#allocation64_spill] sm:$0xff] }
 0x2ce   :  { %v1614_v57 = vpop.permute.xlu0 %1613  ;;  %v3422_v61 = vpop.permute.xlu1 %1952  ;;  %v1183_v2 = vsub.f32 0.0, %v1949_v63  ;;  %v3860_v63 = vld [vmem:[#allocation53_spill] sm:$0xff] }
 0x2cf   :  { %v1660_v1 = vsel %vm1412_vm14, %v1614_v57, 0.0  ;;  %1506 = vrot.lane.b32.xlu1 %v1464_v7, %s2124_s1  ;;  %1502 = vrot.lane.b32.xlu0 %v1462_v40, %s2124_s1  ;;  %v1954_v37 = vunpack.i.l.bf16 %v3422_v61  ;;  %v1200_v8 = vmul.f32 %v1184_v53, %v1184_v53  ;;  %v1760_v40 = vsel %vm1412_vm14, %v1919_v35, 0.0 }
 0x2d0   :  { %v3432_v45 = vadd.f32 %v1660_v1, %v3363_v6  ;;  %v2114_v6 = vpop.eup %2113  ;;  %v1762_v25 = vadd.f32 %v1761_v18, %v1760_v40  ;;  %v1199_v35 = vmul.f32 %v1183_v2, %v1183_v2 }
 0x2d1   :  { %v2116_v42 = vpop.eup %2115  ;;  %v670_v46 = vmul.f32 0.6931472, %v2114_v6  ;;  %v1185_v16 = vsub.f32 0.0, %v1954_v37  ;;  %v1467_v3 = vmul.f32 0.0, %v1200_v8 }
 0x2d2   :  { %v3437_v34 = vpop.permute.xlu0 %1374  ;;  %v1958_v33 = vpop.permute.xlu1 %1957  ;;  %v3452_v56 = vmul.f32 %v2116_v42, %v3856_v10 }
 0x2d3   :  { %v1960_v51 = vunpack.i.h.bf16 %v1958_v33  ;;  %v1959_v23 = vunpack.i.l.bf16 %v1958_v33  ;;  %1388 = vrot.lane.b32.xlu1 %v1344_v17, %s2124_s1  ;;  %1508 = vrot.lane.b32.xlu0 %v1465_v12, %s2124_s1  ;;  %v1417_v17 = vadd.f32 %v1416_v13, %v3395_v60  ;;  %v706_v33 = vsub.f32 %v690_v32, %v3858_v55  ;;  %v3861_v13 = vld [vmem:[#allocation69_spill] sm:$0xff] }
 0x2d4   :  { %v1422_v0 = vsel %vm1412_vm14, %v3437_v34, 0.0 }
 0x2d5   :  { %v1172_v50 = vsub.f32 %v354_v11, %v1960_v51  ;;  %v1171_v9 = vsub.f32 %v353_v48, %v1959_v23  ;;  %v688_v48 = vadd.f32 %v670_v46, %v3857_v59  ;;  %v753_v51 = vsub.f32 1.0, %v3452_v56 }
 0x2d6   :  { %v1968_v19 = vpop.permute.xlu0 %1967  ;;  %v1371_v41 = vpop.permute.xlu1 %1370  ;;  %v802_v6 = vmul.f32 %v786_v39, %v706_v33 }
 0x2d7   :  { %v1187_v47 = vmul.f32 %v1171_v9, %v1171_v9  ;;  %1631 = vrot.lane.b32.xlu1 %v1587_v30, %s2124_s1  ;;  %v1188_v14 = vmul.f32 %v1172_v50, %v1172_v50  ;;  %v1969_v1 = vunpack.i.l.bf16 %v1968_v19  ;;  %v1418_v43 = vsel %vm1412_vm14, %v1371_v41, 0.0  ;;  %v3859_v41 = vld [vmem:[#allocation63_spill] sm:$0xff] }
 0x2d8   :  { %v1970_v15 = vunpack.i.h.bf16 %v1968_v19  ;;  %v1419_v49 = vadd.f32 %v1418_v43, %v1417_v17  ;;  %v1586_v30 = vmul.f32 0.0, %v1327_v29  ;;  %v704_v46 = vsub.f32 %v688_v48, %v3859_v41 }
 0x2d9   :  { %v1454_v7 = vmul.f32 %v3162_v21, %v1187_v47  ;;  %v1201_v21 = vmul.f32 %v1185_v16, %v1185_v16  ;;  %v1455_v12 = vmul.f32 %v3168_v58, %v1188_v14  ;;  %v1767_v60 = vsel %vm1412_vm14, %v1969_v1, 0.0  ;;  %v2118_v58 = vpop.eup %2117 }
 0x2da   :  { %v1963_v57 = vpop.permute.xlu1 %1962  ;;  %v3466_v4 = vpop.permute.xlu0 %1376  ;;  %v1769_v50 = vsel %vm1412_vm14, %v1970_v15, 0.0  ;;  %v672_v19 = vmul.f32 0.6931472, %v2118_v58  ;;  %v800_v10 = vmul.f32 %v784_v24, %v704_v46  ;;  %v1347_v34 = vmul.f32 0.0, %v802_v6 }
 0x2db   :  { %v1965_v62 = vunpack.i.h.bf16 %v1963_v57  ;;  %v1964_v22 = vunpack.i.l.bf16 %v1963_v57  ;;  %1512 = vrot.lane.b32.xlu1 %v1467_v3, %s2124_s1  ;;  %1486 = vrot.lane.b32.xlu0 %v1454_v7, %s2124_s1  ;;  %v1468_v8 = vmul.f32 0.0, %v1201_v21  ;;  %v769_v56 = vmul.f32 0.25, %v753_v51 }
 0x2dc   :  { %v1466_v47 = vmul.f32 0.0, %v1199_v35  ;;  %v689_v16 = vadd.f32 %v672_v19, %v3860_v63  ;;  %v1345_v7 = vmul.f32 0.0, %v800_v10 }
 0x2dd   :  { %v1765_v53 = vsel %vm1412_vm14, %v1965_v62, 0.0  ;;  %v1763_v52 = vsel %vm1412_vm14, %v1964_v22, 0.0  ;;  %v785_v39 = vmul.f32 %v769_v56, %v753_v51  ;;  %v1955_v62 = vunpack.i.h.bf16 %v3422_v61 }
 0x2de   :  { %v1764_v38 = vadd.f32 %v1763_v52, %v1762_v25  ;;  %v1373_v11 = vpop.permute.xlu1 %1372  ;;  %v1620_v42 = vpop.permute.xlu0 %1619  ;;  %v705_v57 = vsub.f32 %v689_v16, %v3861_v13  ;;  %v1330_v25 = vsub.f32 0.0, %v3345_v36 }
 0x2df   :  { %v1420_v23 = vsel %vm1412_vm14, %v1373_v11, 0.0  ;;  %1633 = vrot.lane.b32.xlu1 %v1588_v31, %s2124_s1  ;;  %1488 = vrot.lane.b32.xlu0 %v1455_v12, %s2124_s1  ;;  %v1666_v29 = vsel %vm1412_vm14, %v1620_v42, 0.0  ;;  %v1186_v2 = vsub.f32 0.0, %v1955_v62  ;;  %v1331_v12 = vsub.f32 0.0, %v3334_v20 }
 0x2e0   :  { %v1766_v27 = vadd.f32 %v1765_v53, %v1764_v38  ;;  %v1421_v37 = vadd.f32 %v1420_v23, %v1419_v49  ;;  %v801_v43 = vmul.f32 %v785_v39, %v705_v57  ;;  %v1589_v21 = vmul.f32 0.0, %v1330_v25 }
 0x2e1   :  { %v1202_v17 = vmul.f32 %v1186_v2, %v1186_v2  ;;  %v1590_v61 = vmul.f32 0.0, %v1331_v12  ;;  %v1424_v42 = vsel %vm1412_vm14, %v3466_v4, 0.0 }
 0x2e2   :  { %v1768_v9 = vadd.f32 %v1767_v60, %v1766_v27  ;;  %v3481_v54 = vadd.f32 %v1422_v0, %v1421_v37  ;;  %v1616_v26 = vpop.permute.xlu1 %1615  ;;  %v1622_v3 = vpop.permute.xlu0 %1621  ;;  %v1346_v22 = vmul.f32 0.0, %v801_v43 }
 0x2e3   :  { %v1662_v28 = vsel %vm1412_vm14, %v1616_v26, 0.0  ;;  %1514 = vrot.lane.b32.xlu1 %v1468_v8, %s2124_s1  ;;  %1629 = vrot.lane.b32.xlu0 %v1586_v30, %s2124_s1  ;;  %v1469_v15 = vmul.f32 0.0, %v1202_v17 }
 0x2e4   :  { %v3487_v32 = vadd.f32 %v1769_v50, %v1768_v9  ;;  %v1663_v5 = vadd.f32 %v1662_v28, %v3432_v45  ;;  %v1668_v45 = vsel %vm1412_vm14, %v1622_v3, 0.0  ;;  %v1425_v46 = vadd.f32 %v1424_v42, %v3481_v54 }
 0x2e6   :  { %v1618_v18 = vpop.permute.xlu1 %1617  ;;  %v1383_v59 = vpop.permute.xlu0 %1382 }
 0x2e7   :  { %v1664_v40 = vsel %vm1412_vm14, %v1618_v18, 0.0  ;;  %1394 = vrot.lane.b32.xlu1 %v1347_v34, %s2124_s1  ;;  %1510 = vrot.lane.b32.xlu0 %v1466_v47, %s2124_s1  ;;  %v1430_v57 = vsel %vm1412_vm14, %v1383_v59, 0.0 }
 0x2e8   :  { %v1665_v14 = vadd.f32 %v1664_v40, %v1663_v5 }
 0x2ea   :  { %v1667_v31 = vadd.f32 %v1666_v29, %v1665_v14  ;;  %v1379_v53 = vpop.permute.xlu1 %1378  ;;  %v3513_v48 = vpop.permute.xlu0 %1977 }
 0x2eb   :  { %1390 = vrot.lane.b32.xlu0 %v1345_v7, %s2124_s1  ;;  %1740 = vrot.lane.b32.xlu1 %v3806_v44, %s2124_s1  ;;  %v1426_v26 = vsel %vm1412_vm14, %v1379_v53, 0.0  ;;  %v1979_v54 = vunpack.i.l.bf16 %v3513_v48 }
 0x2ec   :  { %v3500_v1 = vadd.f32 %v1668_v45, %v1667_v31  ;;  %v1427_v18 = vadd.f32 %v1426_v26, %v1425_v46 }
 0x2ed   :  { %v1775_v25 = vsel %vm1412_vm14, %v1979_v54, 0.0 }
 0x2ee   :  { %v1385_v33 = vpop.permute.xlu0 %1384 }
 0x2ef   :  { %1987 = vrot.lane.b32.xlu0 %v3806_v44, %s2124_s1  ;;  %1742 = vrot.lane.b32.xlu1 %v3806_v44, %s2124_s1  ;;  %v1973_v44 = vpop.permute.xlu1 %1972  ;;  %v1432_v17 = vsel %vm1412_vm14, %v1385_v33, 0.0 }
 0x2f0   :  { %v1974_v50 = vunpack.i.l.bf16 %v1973_v44  ;;  %v1975_v34 = vunpack.i.h.bf16 %v1973_v44 }
 0x2f2   :  { %v3515_v38 = vpop.permute.xlu0 %1627  ;;  %v1771_v56 = vsel %vm1412_vm14, %v1974_v50, 0.0  ;;  %v1773_v7 = vsel %vm1412_vm14, %v1975_v34, 0.0 }
 0x2f3   :  { %1392 = vrot.lane.b32.xlu0 %v1346_v22, %s2124_s1  ;;  %v1381_v52 = vpop.permute.xlu1 %1380  ;;  %v1772_v40 = vadd.f32 %v1771_v56, %v3487_v32  ;;  %v1980_v32 = vunpack.i.h.bf16 %v3513_v48 }
 0x2f4   :  { %v1428_v47 = vsel %vm1412_vm14, %v1381_v52, 0.0 }
 0x2f5   :  { %v1429_v3 = vadd.f32 %v1428_v47, %v1427_v18  ;;  %v1774_v43 = vadd.f32 %v1773_v7, %v1772_v40 }
 0x2f7   :  { %1635 = vrot.lane.b32.xlu0 %v1589_v21, %s2124_s1  ;;  %v1624_v36 = vpop.permute.xlu1 %1623  ;;  %v1431_v62 = vadd.f32 %v1430_v57, %v1429_v3  ;;  %v1776_v59 = vadd.f32 %v1775_v25, %v1774_v43 }
 0x2f8   :  { %v1670_v2 = vsel %vm1412_vm14, %v1624_v36, 0.0 }
 0x2f9   :  { %v1671_v48 = vadd.f32 %v1670_v2, %v3500_v1 }
 0x2fb   :  { %1516 = vrot.lane.b32.xlu0 %v1469_v15, %s2124_s1  ;;  %v1626_v55 = vpop.permute.xlu1 %1625 }
 0x2ff   :  { %1637 = vrot.lane.b32.xlu0 %v1590_v61, %s2124_s1  ;;  %v1387_v49 = vpop.permute.xlu1 %1386  ;;  %v1672_v61 = vsel %vm1412_vm14, %v1626_v55, 0.0 }
 0x300   :  { %v1434_v53 = vsel %vm1412_vm14, %v1387_v49, 0.0 }
 0x303   :  { %v3517_v11 = vpop.permute.xlu1 %1982 }
 0x304   :  { %v1984_v44 = vunpack.i.l.bf16 %v3517_v11  ;;  %v1985_v50 = vunpack.i.h.bf16 %v3517_v11 }
 0x331   :  { %v1491_v20 = vpop.permute.xlu0 %1490 }
 0x332   :  { %v1537_v5 = vsel %vm1412_vm14, %v1491_v20, 0.0  ;;  %v1433_v20 = vadd.f32 %v1432_v17, %v1431_v62 }
 0x334   :  { %v1435_v55 = vadd.f32 %v1434_v53, %v1433_v20 }
 0x335   :  { %v1493_v24 = vpop.permute.xlu0 %1492  ;;  %v1497_v51 = vpop.permute.xlu1 %1496 }
 0x336   :  { %v1539_v16 = vsel %vm1412_vm14, %v1493_v24, 0.0  ;;  %v1543_v45 = vsel %vm1412_vm14, %v1497_v51, 0.0  ;;  %v1777_v51 = vsel %vm1412_vm14, %v1980_v32, 0.0 }
 0x337   :  { %v1778_v42 = vadd.f32 %v1777_v51, %v1776_v59 }
 0x339   :  { %v1499_v60 = vpop.permute.xlu1 %1498  ;;  %v1495_v23 = vpop.permute.xlu0 %1494 }
 0x33a   :  { %v1541_v39 = vsel %vm1412_vm14, %v1495_v23, 0.0  ;;  %v1545_v21 = vsel %vm1412_vm14, %v1499_v60, 0.0  ;;  %v1673_v23 = vadd.f32 %v1672_v61, %v1671_v48 }
 0x33d   :  { %v3519_v58 = vpop.permute.xlu1 %1504  ;;  %v1501_v6 = vpop.permute.xlu0 %1500 }
 0x33e   :  { %v1547_v52 = vsel %vm1412_vm14, %v1501_v6, 0.0  ;;  %v1779_v6 = vsel %vm1412_vm14, %v1984_v44, 0.0  ;;  %v1551_v1 = vsel %vm1412_vm14, %v3519_v58, 0.0 }
 0x33f   :  { %v1780_v11 = vadd.f32 %v1779_v6, %v1778_v42 }
 0x341   :  { %v3521_v30 = vpop.permute.xlu1 %1506  ;;  %v1503_v27 = vpop.permute.xlu0 %1502 }
 0x342   :  { %v1549_v33 = vsel %vm1412_vm14, %v1503_v27, 0.0  ;;  %v1674_v27 = vsel %vm1412_vm14, %v3515_v38, 0.0 }
 0x345   :  { %v1389_v37 = vpop.permute.xlu1 %1388  ;;  %v3523_v35 = vpop.permute.xlu0 %1508 }
 0x346   :  { %v1436_v60 = vsel %vm1412_vm14, %v1389_v37, 0.0  ;;  %v1553_v37 = vsel %vm1412_vm14, %v3521_v30, 0.0  ;;  %v1555_v18 = vsel %vm1412_vm14, %v3523_v35, 0.0 }
 0x347   :  { %v1437_v26 = vadd.f32 %v1436_v60, %v1435_v55 }
 0x349   :  { %v3525_v8 = vpop.permute.xlu1 %1631 }
 0x34d   :  { %v1487_v0 = vpop.permute.xlu0 %1486  ;;  %v3533_v28 = vpop.permute.xlu1 %1512 }
 0x34e   :  { %v1534_v19 = vsel %vm1412_vm14, %v1487_v0, 0.0  ;;  %v1559_v35 = vsel %vm1412_vm14, %v3533_v28, 0.0 }
 0x351   :  { %v1489_v9 = vpop.permute.xlu0 %1488  ;;  %v3543_v29 = vpop.permute.xlu1 %1633 }
 0x352   :  { %v1535_v41 = vsel %vm1412_vm14, %v1489_v9, 0.0  ;;  %v1680_v2 = vsel %vm1412_vm14, %v3543_v29, 0.0 }
 0x353   :  { %v1536_v10 = vadd.f32 %v1535_v41, %v1534_v19 }
 0x355   :  { %v1538_v4 = vadd.f32 %v1537_v5, %v1536_v10  ;;  %v1630_v63 = vpop.permute.xlu0 %1629  ;;  %v1515_v24 = vpop.permute.xlu1 %1514  ;;  %v1675_v10 = vadd.f32 %v1674_v27, %v1673_v23  ;;  %v1781_v5 = vsel %vm1412_vm14, %v1985_v50, 0.0 }
 0x356   :  { %v1676_v41 = vsel %vm1412_vm14, %v1630_v63, 0.0 }
 0x357   :  { %v1540_v14 = vadd.f32 %v1539_v16, %v1538_v4  ;;  %v1677_v38 = vadd.f32 %v1676_v41, %v1675_v10 }
 0x359   :  { %v1542_v31 = vadd.f32 %v1541_v39, %v1540_v14  ;;  %v1511_v13 = vpop.permute.xlu0 %1510  ;;  %v1395_v34 = vpop.permute.xlu1 %1394  ;;  %v1782_v14 = vadd.f32 %v1781_v5, %v1780_v11 }
 0x35a   :  { %v1442_v30 = vsel %vm1412_vm14, %v1395_v34, 0.0  ;;  %v1557_v63 = vsel %vm1412_vm14, %v1511_v13, 0.0  ;;  %v1561_v13 = vsel %vm1412_vm14, %v1515_v24, 0.0 }
 0x35b   :  { %v1544_v22 = vadd.f32 %v1543_v45, %v1542_v31  ;;  %v1678_v31 = vsel %vm1412_vm14, %v3525_v8, 0.0 }
 0x35c   :  { %v1679_v45 = vadd.f32 %v1678_v31, %v1677_v38 }
 0x35d   :  { %v1546_v12 = vadd.f32 %v1545_v21, %v1544_v22  ;;  %v1391_v15 = vpop.permute.xlu0 %1390  ;;  %v1741_v22 = vpop.permute.xlu1 %1740 }
 0x35e   :  { %v1438_v9 = vsel %vm1412_vm14, %v1391_v15, 0.0  ;;  %v1787_v61 = vsel %vm1412_vm14, %v1741_v22, 0.0 }
 0x35f   :  { %v1548_v36 = vadd.f32 %v1547_v52, %v1546_v12  ;;  %v1439_v47 = vadd.f32 %v1438_v9, %v1437_v26  ;;  %v1681_v12 = vadd.f32 %v1680_v2, %v1679_v45 }
 0x361   :  { %v1550_v0 = vadd.f32 %v1549_v33, %v1548_v36  ;;  %v1988_v49 = vpop.permute.xlu0 %1987  ;;  %v1743_v53 = vpop.permute.xlu1 %1742 }
 0x362   :  { %v1989_v46 = vunpack.i.l.bf16 %v1988_v49  ;;  %v1990_v57 = vunpack.i.h.bf16 %v1988_v49  ;;  %v1789_v29 = vsel %vm1412_vm14, %v1743_v53, 0.0 }
 0x363   :  { %v1552_v19 = vadd.f32 %v1551_v1, %v1550_v0 }
 0x364   :  { %v1783_v3 = vsel %vm1412_vm14, %v1989_v46, 0.0  ;;  %v1785_v21 = vsel %vm1412_vm14, %v1990_v57, 0.0 }
 0x365   :  { %v1554_v56 = vadd.f32 %v1553_v37, %v1552_v19  ;;  %v1393_v58 = vpop.permute.xlu0 %1392  ;;  %v1784_v62 = vadd.f32 %v1783_v3, %v1782_v14 }
 0x366   :  { %v1440_v4 = vsel %vm1412_vm14, %v1393_v58, 0.0 }
 0x367   :  { %v1556_v16 = vadd.f32 %v1555_v18, %v1554_v56  ;;  %v1441_v40 = vadd.f32 %v1440_v4, %v1439_v47  ;;  %v1786_v28 = vadd.f32 %v1785_v21, %v1784_v62 }
 0x369   :  { %v1558_v54 = vadd.f32 %v1557_v63, %v1556_v16  ;;  %v1443_v7 = vadd.f32 %v1442_v30, %v1441_v40  ;;  %v1636_v39 = vpop.permute.xlu0 %1635  ;;  %v1788_v48 = vadd.f32 %v1787_v61, %v1786_v28 }
 0x36a   :  { %v1682_v8 = vsel %vm1412_vm14, %v1636_v39, 0.0 }
 0x36b   :  { %v1560_v43 = vadd.f32 %v1559_v35, %v1558_v54  ;;  %1444 = vadd.xlane.f32.xlu0 %v1443_v7  ;;  %v1683_v44 = vadd.f32 %v1682_v8, %v1681_v12  ;;  %v1790_v24 = vadd.f32 %v1789_v29, %v1788_v48 }
 0x36d   :  { %v1562_v32 = vadd.f32 %v1561_v13, %v1560_v43  ;;  %v1517_v25 = vpop.permute.xlu0 %1516 }
 0x36e   :  { %v1563_v17 = vsel %vm1412_vm14, %v1517_v25, 0.0 }
 0x36f   :  { %v1564_v15 = vadd.f32 %v1563_v17, %v1562_v32 }
 0x371   :  { %1565 = vadd.xlane.f32.xlu1 %v1564_v15  ;;  %v1638_v52 = vpop.permute.xlu0 %1637 }
 0x372   :  { %v1684_v59 = vsel %vm1412_vm14, %v1638_v52, 0.0 }
 0x373   :  { %v1685_v20 = vadd.f32 %v1684_v59, %v1683_v44 }
 0x375   :  { %1686 = vadd.xlane.f32.xlu0 %v1685_v20 }
 0x379   :  { %1791 = vadd.xlane.f32.xlu0 %v1790_v24 }
 0x3f8   :  { %v1445_v36 = vpop.xlane.xlu0 %1444 }
 0x3f9   :  { %v1446_v51 = vrot.slane %v1445_v36, 4 }
 0x3fb   :  { %v1447_v33 = vadd.f32 %v1446_v51, %v1445_v36 }
 0x3fd   :  { %v1448_v60 = vrot.slane %v1447_v33, 2 }
 0x3fe   :  { %v1566_v23 = vpop.xlane.xlu1 %1565 }
 0x3ff   :  { %v1567_v55 = vrot.slane %v1566_v23, 4  ;;  %v1449_v0 = vadd.f32 %v1448_v60, %v1447_v33 }
 0x401   :  { %v1568_v49 = vadd.f32 %v1567_v55, %v1566_v23  ;;  %v1450_v50 = vrot.slane %v1449_v0, 1 }
 0x402   :  { %v1687_v6 = vpop.xlane.xlu0 %1686 }
 0x403   :  { %v1569_v1 = vrot.slane %v1568_v49, 2  ;;  %v1688_v9 = vrot.slane %v1687_v6, 4  ;;  %v1451_v42 = vadd.f32 %v1450_v50, %v1449_v0 }
 0x405   :  { %v1570_v26 = vadd.f32 %v1569_v1, %v1568_v49  ;;  %v1689_v19 = vadd.f32 %v1688_v9, %v1687_v6  ;;  %1862 = vpush %v1451_v42 }
 0x406   :  { %v1792_v27 = vpop.xlane.xlu0 %1791 }
 0x407   :  { %v1690_v37 = vrot.slane %v1689_v19, 2  ;;  %v1793_v41 = vrot.slane %v1792_v27, 4  ;;  %v1571_v46 = vrot.slane %v1570_v26, 1 }
 0x409   :  { %v1794_v11 = vadd.f32 %v1793_v41, %v1792_v27  ;;  %v1572_v10 = vadd.f32 %v1571_v46, %v1570_v26  ;;  %v1691_v34 = vadd.f32 %v1690_v37, %v1689_v19 }
 0x40b   :  { %v1795_v56 = vrot.slane %v1794_v11, 2  ;;  %1864 = vpush %v1572_v10  ;;  %v1692_v47 = vrot.slane %v1691_v34, 1 }
 0x40d   :  { %v1796_v58 = vadd.f32 %v1795_v56, %v1794_v11  ;;  %v1693_v5 = vadd.f32 %v1692_v47, %v1691_v34 }
 0x40f   :  { %1866 = vpush %v1693_v5  ;;  %v1797_v18 = vrot.slane %v1796_v58, 1 }
 0x411   :  { %v1798_v4 = vadd.f32 %v1797_v18, %v1796_v58 }
 0x413   :  { %1868 = vpush %v1798_v4 }
 0x436   :  { %s1863_s25 = spop %1862 }
 0x437   :  { %v1453_v40 = vstv %s1863_s25 }
 0x43c   :  { %s1865_s26 = spop %1864 }
 0x43d   :  { %v1574_v38 = vstv %s1865_s26 }
 0x43e   :  { %v1802_v30 = vsel %vm1801_vm10, %v1453_v40, %v1574_v38 }
 0x440   :  { %s1867_s27 = spop %1866 }
 0x441   :  { %v1695_v16 = vstv %s1867_s27 }
 0x442   :  { %v1804_v63 = vsel %vm1803_vm8, %v1802_v30, %v1695_v16 }
 0x444   :  { %s1869_s28 = spop %1868 }
 0x445   :  { %v1800_v3 = vstv %s1869_s28 }
 0x446   :  { %v1806_v14 = vsel %vm1805_vm2, %v1804_v63, %v1800_v3 }
 0x447   :  { %1807 = vst [vmem:[%s3596_s3] sm:$0xf] %v1806_v14 }

</bundles_post_ra>
